<compile_context>
chip_gen: v7x
topology: tpu7x:2x2x1
jax: 0.10.0
libtpu: 0.0.40
codegen_flags: <defaults>
</compile_context>

<pallas_src>
import functools

import jax
import jax.numpy as jnp
import numpy as np
from jax.experimental import pallas as pl
from jax.experimental.pallas import tpu as pltpu


def make_frequencies(n_harmonic_functions: int = 6,
                     omega0: float = 1.0,
                     logspace: bool = True):
    """Compile-time frequency constants (matches the torch buffer)."""
    if logspace:
        freqs = 2.0 ** np.arange(n_harmonic_functions, dtype=np.float64)
    else:
        freqs = np.linspace(1.0, 2.0 ** (n_harmonic_functions - 1),
                            n_harmonic_functions, dtype=np.float64)
    return tuple(float(omega0) * float(f) for f in freqs)


def _is_pow2_ladder(freqs) -> bool:
    """True iff freqs[h+1] == 2 * freqs[h] for all h (logspace ladder)."""
    if len(freqs) < 2:
        return False
    return all(abs(freqs[h + 1] - 2.0 * freqs[h]) <= 1e-12 * abs(freqs[h + 1]) + 1e-300
               for h in range(len(freqs) - 1))


def _round_up(v: int, m: int) -> int:
    return ((v + m - 1) // m) * m


def _harmonic_kernel(x_ref, o_ref, *, freqs, include_input, use_recurrence,
                     anchor_stride, assemble):
    """x_ref: (C, tile_n) channel-first, lane-dense.
       o_ref: (out_dim, tile_n), out_dim = 2*C*H (+ C if include_input).

       Row ordering matches torch: row c*H + h        -> sin(freq[h] * x[c])
                                   row C*H + c*H + h  -> cos(freq[h] * x[c])
                                   row 2*C*H + c      -> x[c]
    """
    x = x_ref[...].astype(jnp.float32)            # all math in f32
    C = x.shape[0]
    H = len(freqs)

    sin_h = [None] * H
    cos_h = [None] * H
    if use_recurrence:
        # freqs is a powers-of-two ladder: evaluate sin/cos exactly only at the
        # anchor octaves; derive the rest with the double-angle recurrence.
        for h0 in range(0, H, anchor_stride):
            ang = x * freqs[h0]                   # (C, tile_n), lane-dense
            s, c = jnp.sin(ang), jnp.cos(ang)
            sin_h[h0], cos_h[h0] = s, c
            for h in range(h0 + 1, min(h0 + anchor_stride, H)):
                s, c = 2.0 * s * c, c * c - s * s
                sin_h[h], cos_h[h] = s, c
    else:
        for h in range(H):
            ang = x * freqs[h]
            sin_h[h], cos_h[h] = jnp.sin(ang), jnp.cos(ang)

    if assemble == "concat":
        # One bulk (out_dim, tile_n) block, one aligned full-block store.
        rows = [sin_h[h][ci:ci + 1, :] for ci in range(C) for h in range(H)]
        rows += [cos_h[h][ci:ci + 1, :] for ci in range(C) for h in range(H)]
        if include_input:
            rows.append(x)
        o_ref[...] = jnp.concatenate(rows, axis=0).astype(o_ref.dtype)
    else:
        # Conservative fallback: one masked single-row store per output row.
        for ci in range(C):
            for h in range(H):
                o_ref[ci * H + h, :] = sin_h[h][ci, :].astype(o_ref.dtype)
                o_ref[C * H + ci * H + h, :] = cos_h[h][ci, :].astype(o_ref.dtype)
        if include_input:
            o_ref[2 * C * H:, :] = x.astype(o_ref.dtype)


def harmonic_embedding(x: jnp.ndarray,
                       frequencies,
                       include_input: bool = True,
                       *,
                       max_tile_n: int = 16384,
                       anchor_stride: int = 3) -> jnp.ndarray:
    *lead, C = x.shape
    H = len(frequencies)
    out_dim = 2 * C * H + (C if include_input else 0)
    N = int(np.prod(lead)) if lead else 1

    # Channel-first, lane-dense: flattened points on the (fast) lane axis.
    xt = x.reshape(N, C).T                                    # (C, N)

    # Balanced lane tiles: a single grid step unless N exceeds the tile cap;
    # when it does, split into equal-sized 128-aligned tiles.
    n128 = _round_up(max(N, 1), 128)
    num_tiles = -(-n128 // max_tile_n)                        # cdiv
    tile_n = _round_up(-(-n128 // num_tiles), 128)
    n_pad = tile_n * num_tiles
    if n_pad > N:
        xt = jnp.pad(xt, ((0, 0), (0, n_pad - N)))            # zeros, discarded

    use_recurrence = _is_pow2_ladder(frequencies) and anchor_stride > 1

    def build(assemble):
        kernel = functools.partial(
            _harmonic_kernel,
            freqs=tuple(float(f) for f in frequencies),
            include_input=include_input,
            use_recurrence=use_recurrence,
            anchor_stride=anchor_stride,
            assemble=assemble)
        return pl.pallas_call(
            kernel,
            out_shape=jax.ShapeDtypeStruct((out_dim, n_pad), x.dtype),
            grid_spec=pltpu.PrefetchScalarGridSpec(
                num_scalar_prefetch=0,
                grid=(num_tiles,),
                in_specs=[pl.BlockSpec((C, tile_n), lambda i: (0, i))],
                out_specs=pl.BlockSpec((out_dim, tile_n), lambda i: (0, i)),
            ),
            compiler_params=pltpu.CompilerParams(
                dimension_semantics=("parallel",),
                vmem_limit_bytes=32 * 1024 * 1024,
            ),
        )

    try:
        out_t = build("concat")(xt)          # preferred: single bulk store
    except Exception:
        out_t = build("rows")(xt)            # conservative fallback

    # TODO(synk): consumers that accept a channel-first (out_dim, N) layout
    # should use `out_t` directly and skip this extra HBM transpose pass.
    out = out_t[:, :N].T                                       # (N, out_dim)
    return out.reshape(*lead, out_dim)


def harmonic_embedding_ref(x, frequencies, include_input=True):
    freqs = jnp.asarray(frequencies, dtype=jnp.float32)
    embed = (x[..., None].astype(jnp.float32) * freqs).reshape(*x.shape[:-1], -1)
    pieces = [jnp.sin(embed), jnp.cos(embed)]
    if include_input:
        pieces.append(x.astype(jnp.float32))
    return jnp.concatenate(pieces, axis=-1).astype(x.dtype)


if __name__ == "__main__":
    key = jax.random.PRNGKey(0)
    in_channels = 3
    n_harmonic_functions = 6
    omega0 = 1.0

    # deterministic "buffer" built in-script, as python constants
    frequencies = make_frequencies(n_harmonic_functions, omega0, logspace=True)

    # small example: batch of 2 rays, 64 samples each, 3-D coordinates
    x = jax.random.normal(key, (2, 64, in_channels), dtype=jnp.float32)

    out = harmonic_embedding(x, frequencies, include_input=True)
    out = jax.block_until_ready(out)

    expected_dim = n_harmonic_functions * 2 * in_channels + in_channels
    assert out.shape == (2, 64, expected_dim), out.shape

    ref = harmonic_embedding_ref(x, frequencies, include_input=True)
    np.testing.assert_allclose(np.asarray(out), np.asarray(ref),
                               rtol=2e-5, atol=2e-5)

    # second case: flattened N not a multiple of 128 (exercises lane padding)
    x2 = jax.random.normal(jax.random.PRNGKey(1), (5, 17, in_channels),
                           dtype=jnp.float32)
    out2 = jax.block_until_ready(harmonic_embedding(x2, frequencies, True))
    assert out2.shape == (5, 17, expected_dim), out2.shape
    ref2 = harmonic_embedding_ref(x2, frequencies, True)
    np.testing.assert_allclose(np.asarray(out2), np.asarray(ref2),
                               rtol=2e-5, atol=2e-5)

    print("KERNEL_OK")
</pallas_src>

<mosaic_0001>
module attributes {stable_mosaic.version = 11 : i64} {
  func.func @_harmonic_kernel(%arg0: i32, %arg1: memref<3x128xf32, #tpu.memory_space<vmem>>, %arg2: memref<39x128xf32, #tpu.memory_space<vmem>>) attributes {dimension_semantics = [#tpu.dimension_semantics<parallel>], iteration_bounds = array<i64: 1>, scalar_prefetch = 0 : i64, scratch_operands = 0 : i64, tpu.core_type = #tpu.core_type<tc>, window_params = [{transform_indices = @transform_0, window_bounds = array<i64: 3, 128>}, {transform_indices = @transform_1, window_bounds = array<i64: 39, 128>}]} {
    %c0 = arith.constant 0 : index
    %c0_0 = arith.constant 0 : index
    %0 = vector.load %arg1[%c0, %c0_0] : memref<3x128xf32, #tpu.memory_space<vmem>>, vector<3x128xf32>
    %cst = arith.constant 1.000000e+00 : f32
    %1 = vector.broadcast %cst : f32 to vector<3x128xf32>
    %2 = arith.mulf %0, %1 : vector<3x128xf32>
    %3 = math.sin %2 : vector<3x128xf32>
    %4 = math.cos %2 : vector<3x128xf32>
    %cst_1 = arith.constant 2.000000e+00 : f32
    %5 = vector.broadcast %cst_1 : f32 to vector<3x128xf32>
    %6 = arith.mulf %5, %3 : vector<3x128xf32>
    %7 = arith.mulf %6, %4 : vector<3x128xf32>
    %8 = arith.mulf %4, %4 : vector<3x128xf32>
    %9 = arith.mulf %3, %3 : vector<3x128xf32>
    %10 = arith.subf %8, %9 : vector<3x128xf32>
    %cst_2 = arith.constant 2.000000e+00 : f32
    %11 = vector.broadcast %cst_2 : f32 to vector<3x128xf32>
    %12 = arith.mulf %11, %7 : vector<3x128xf32>
    %13 = arith.mulf %12, %10 : vector<3x128xf32>
    %14 = arith.mulf %10, %10 : vector<3x128xf32>
    %15 = arith.mulf %7, %7 : vector<3x128xf32>
    %16 = arith.subf %14, %15 : vector<3x128xf32>
    %cst_3 = arith.constant 8.000000e+00 : f32
    %17 = vector.broadcast %cst_3 : f32 to vector<3x128xf32>
    %18 = arith.mulf %0, %17 : vector<3x128xf32>
    %19 = math.sin %18 : vector<3x128xf32>
    %20 = math.cos %18 : vector<3x128xf32>
    %cst_4 = arith.constant 2.000000e+00 : f32
    %21 = vector.broadcast %cst_4 : f32 to vector<3x128xf32>
    %22 = arith.mulf %21, %19 : vector<3x128xf32>
    %23 = arith.mulf %22, %20 : vector<3x128xf32>
    %24 = arith.mulf %20, %20 : vector<3x128xf32>
    %25 = arith.mulf %19, %19 : vector<3x128xf32>
    %26 = arith.subf %24, %25 : vector<3x128xf32>
    %cst_5 = arith.constant 2.000000e+00 : f32
    %27 = vector.broadcast %cst_5 : f32 to vector<3x128xf32>
    %28 = arith.mulf %27, %23 : vector<3x128xf32>
    %29 = arith.mulf %28, %26 : vector<3x128xf32>
    %30 = arith.mulf %26, %26 : vector<3x128xf32>
    %31 = arith.mulf %23, %23 : vector<3x128xf32>
    %32 = arith.subf %30, %31 : vector<3x128xf32>
    %33 = vector.extract_strided_slice %3 {offsets = [0, 0], sizes = [1, 128], strides = [1, 1]} : vector<3x128xf32> to vector<1x128xf32>
    %34 = vector.extract_strided_slice %7 {offsets = [0, 0], sizes = [1, 128], strides = [1, 1]} : vector<3x128xf32> to vector<1x128xf32>
    %35 = vector.extract_strided_slice %13 {offsets = [0, 0], sizes = [1, 128], strides = [1, 1]} : vector<3x128xf32> to vector<1x128xf32>
    %36 = vector.extract_strided_slice %19 {offsets = [0, 0], sizes = [1, 128], strides = [1, 1]} : vector<3x128xf32> to vector<1x128xf32>
    %37 = vector.extract_strided_slice %23 {offsets = [0, 0], sizes = [1, 128], strides = [1, 1]} : vector<3x128xf32> to vector<1x128xf32>
    %38 = vector.extract_strided_slice %29 {offsets = [0, 0], sizes = [1, 128], strides = [1, 1]} : vector<3x128xf32> to vector<1x128xf32>
    %39 = vector.extract_strided_slice %3 {offsets = [1, 0], sizes = [1, 128], strides = [1, 1]} : vector<3x128xf32> to vector<1x128xf32>
    %40 = vector.extract_strided_slice %7 {offsets = [1, 0], sizes = [1, 128], strides = [1, 1]} : vector<3x128xf32> to vector<1x128xf32>
    %41 = vector.extract_strided_slice %13 {offsets = [1, 0], sizes = [1, 128], strides = [1, 1]} : vector<3x128xf32> to vector<1x128xf32>
    %42 = vector.extract_strided_slice %19 {offsets = [1, 0], sizes = [1, 128], strides = [1, 1]} : vector<3x128xf32> to vector<1x128xf32>
    %43 = vector.extract_strided_slice %23 {offsets = [1, 0], sizes = [1, 128], strides = [1, 1]} : vector<3x128xf32> to vector<1x128xf32>
    %44 = vector.extract_strided_slice %29 {offsets = [1, 0], sizes = [1, 128], strides = [1, 1]} : vector<3x128xf32> to vector<1x128xf32>
    %45 = vector.extract_strided_slice %3 {offsets = [2, 0], sizes = [1, 128], strides = [1, 1]} : vector<3x128xf32> to vector<1x128xf32>
    %46 = vector.extract_strided_slice %7 {offsets = [2, 0], sizes = [1, 128], strides = [1, 1]} : vector<3x128xf32> to vector<1x128xf32>
    %47 = vector.extract_strided_slice %13 {offsets = [2, 0], sizes = [1, 128], strides = [1, 1]} : vector<3x128xf32> to vector<1x128xf32>
    %48 = vector.extract_strided_slice %19 {offsets = [2, 0], sizes = [1, 128], strides = [1, 1]} : vector<3x128xf32> to vector<1x128xf32>
    %49 = vector.extract_strided_slice %23 {offsets = [2, 0], sizes = [1, 128], strides = [1, 1]} : vector<3x128xf32> to vector<1x128xf32>
    %50 = vector.extract_strided_slice %29 {offsets = [2, 0], sizes = [1, 128], strides = [1, 1]} : vector<3x128xf32> to vector<1x128xf32>
    %51 = vector.extract_strided_slice %4 {offsets = [0, 0], sizes = [1, 128], strides = [1, 1]} : vector<3x128xf32> to vector<1x128xf32>
    %52 = vector.extract_strided_slice %10 {offsets = [0, 0], sizes = [1, 128], strides = [1, 1]} : vector<3x128xf32> to vector<1x128xf32>
    %53 = vector.extract_strided_slice %16 {offsets = [0, 0], sizes = [1, 128], strides = [1, 1]} : vector<3x128xf32> to vector<1x128xf32>
    %54 = vector.extract_strided_slice %20 {offsets = [0, 0], sizes = [1, 128], strides = [1, 1]} : vector<3x128xf32> to vector<1x128xf32>
    %55 = vector.extract_strided_slice %26 {offsets = [0, 0], sizes = [1, 128], strides = [1, 1]} : vector<3x128xf32> to vector<1x128xf32>
    %56 = vector.extract_strided_slice %32 {offsets = [0, 0], sizes = [1, 128], strides = [1, 1]} : vector<3x128xf32> to vector<1x128xf32>
    %57 = vector.extract_strided_slice %4 {offsets = [1, 0], sizes = [1, 128], strides = [1, 1]} : vector<3x128xf32> to vector<1x128xf32>
    %58 = vector.extract_strided_slice %10 {offsets = [1, 0], sizes = [1, 128], strides = [1, 1]} : vector<3x128xf32> to vector<1x128xf32>
    %59 = vector.extract_strided_slice %16 {offsets = [1, 0], sizes = [1, 128], strides = [1, 1]} : vector<3x128xf32> to vector<1x128xf32>
    %60 = vector.extract_strided_slice %20 {offsets = [1, 0], sizes = [1, 128], strides = [1, 1]} : vector<3x128xf32> to vector<1x128xf32>
    %61 = vector.extract_strided_slice %26 {offsets = [1, 0], sizes = [1, 128], strides = [1, 1]} : vector<3x128xf32> to vector<1x128xf32>
    %62 = vector.extract_strided_slice %32 {offsets = [1, 0], sizes = [1, 128], strides = [1, 1]} : vector<3x128xf32> to vector<1x128xf32>
    %63 = vector.extract_strided_slice %4 {offsets = [2, 0], sizes = [1, 128], strides = [1, 1]} : vector<3x128xf32> to vector<1x128xf32>
    %64 = vector.extract_strided_slice %10 {offsets = [2, 0], sizes = [1, 128], strides = [1, 1]} : vector<3x128xf32> to vector<1x128xf32>
    %65 = vector.extract_strided_slice %16 {offsets = [2, 0], sizes = [1, 128], strides = [1, 1]} : vector<3x128xf32> to vector<1x128xf32>
    %66 = vector.extract_strided_slice %20 {offsets = [2, 0], sizes = [1, 128], strides = [1, 1]} : vector<3x128xf32> to vector<1x128xf32>
    %67 = vector.extract_strided_slice %26 {offsets = [2, 0], sizes = [1, 128], strides = [1, 1]} : vector<3x128xf32> to vector<1x128xf32>
    %68 = vector.extract_strided_slice %32 {offsets = [2, 0], sizes = [1, 128], strides = [1, 1]} : vector<3x128xf32> to vector<1x128xf32>
    %69 = tpu.concatenate %33, %34, %35, %36, %37, %38, %39, %40, %41, %42, %43, %44, %45, %46, %47, %48 in 0 : vector<1x128xf32>, vector<1x128xf32>, vector<1x128xf32>, vector<1x128xf32>, vector<1x128xf32>, vector<1x128xf32>, vector<1x128xf32>, vector<1x128xf32>, vector<1x128xf32>, vector<1x128xf32>, vector<1x128xf32>, vector<1x128xf32>, vector<1x128xf32>, vector<1x128xf32>, vector<1x128xf32>, vector<1x128xf32> -> vector<16x128xf32>
    %70 = tpu.concatenate %49, %50, %51, %52, %53, %54, %55, %56, %57, %58, %59, %60, %61, %62, %63, %64 in 0 : vector<1x128xf32>, vector<1x128xf32>, vector<1x128xf32>, vector<1x128xf32>, vector<1x128xf32>, vector<1x128xf32>, vector<1x128xf32>, vector<1x128xf32>, vector<1x128xf32>, vector<1x128xf32>, vector<1x128xf32>, vector<1x128xf32>, vector<1x128xf32>, vector<1x128xf32>, vector<1x128xf32>, vector<1x128xf32> -> vector<16x128xf32>
    %71 = tpu.concatenate %65, %66, %67, %68, %0 in 0 : vector<1x128xf32>, vector<1x128xf32>, vector<1x128xf32>, vector<1x128xf32>, vector<3x128xf32> -> vector<7x128xf32>
    %72 = tpu.concatenate %69, %70, %71 in 0 : vector<16x128xf32>, vector<16x128xf32>, vector<7x128xf32> -> vector<39x128xf32>
    %c0_6 = arith.constant 0 : index
    %c0_7 = arith.constant 0 : index
    %73 = vector.load %arg2[%c0_6, %c0_7] : memref<39x128xf32, #tpu.memory_space<vmem>>, vector<39x128xf32>
    tpu.vector_store %arg2[%c0_6, %c0_7], %72 {strides = array<i32>} : memref<39x128xf32, #tpu.memory_space<vmem>>, vector<39x128xf32>,
    return
  }
  func.func @transform_0(%arg0: i32) -> (i32, i32) {
    %c0_i32 = arith.constant 0 : i32
    %c0_i32_0 = arith.constant 0 : i32
    return %c0_i32, %arg0 : i32, i32
  }
  func.func @transform_1(%arg0: i32) -> (i32, i32) {
    %c0_i32 = arith.constant 0 : i32
    %c0_i32_0 = arith.constant 0 : i32
    return %c0_i32, %arg0 : i32, i32
  }
}

module attributes {stable_mosaic.version = 11 : i64} {
  func.func @_harmonic_kernel(%arg0: i32, %arg1: memref<3x128xf32, #tpu.memory_space<vmem>>, %arg2: memref<39x128xf32, #tpu.memory_space<vmem>>) attributes {dimension_semantics = [#tpu.dimension_semantics<parallel>], iteration_bounds = array<i64: 1>, scalar_prefetch = 0 : i64, scratch_operands = 0 : i64, tpu.core_type = #tpu.core_type<tc>, window_params = [{transform_indices = @transform_0, window_bounds = array<i64: 3, 128>}, {transform_indices = @transform_1, window_bounds = array<i64: 39, 128>}]} {
    %c0 = arith.constant 0 : index
    %c0_0 = arith.constant 0 : index
    %0 = vector.load %arg1[%c0, %c0_0] : memref<3x128xf32, #tpu.memory_space<vmem>>, vector<3x128xf32>
    %cst = arith.constant 1.000000e+00 : f32
    %1 = vector.broadcast %cst : f32 to vector<3x128xf32>
    %2 = arith.mulf %0, %1 : vector<3x128xf32>
    %3 = math.sin %2 : vector<3x128xf32>
    %4 = math.cos %2 : vector<3x128xf32>
    %cst_1 = arith.constant 2.000000e+00 : f32
    %5 = vector.broadcast %cst_1 : f32 to vector<3x128xf32>
    %6 = arith.mulf %5, %3 : vector<3x128xf32>
    %7 = arith.mulf %6, %4 : vector<3x128xf32>
    %8 = arith.mulf %4, %4 : vector<3x128xf32>
    %9 = arith.mulf %3, %3 : vector<3x128xf32>
    %10 = arith.subf %8, %9 : vector<3x128xf32>
    %cst_2 = arith.constant 2.000000e+00 : f32
    %11 = vector.broadcast %cst_2 : f32 to vector<3x128xf32>
    %12 = arith.mulf %11, %7 : vector<3x128xf32>
    %13 = arith.mulf %12, %10 : vector<3x128xf32>
    %14 = arith.mulf %10, %10 : vector<3x128xf32>
    %15 = arith.mulf %7, %7 : vector<3x128xf32>
    %16 = arith.subf %14, %15 : vector<3x128xf32>
    %cst_3 = arith.constant 8.000000e+00 : f32
    %17 = vector.broadcast %cst_3 : f32 to vector<3x128xf32>
    %18 = arith.mulf %0, %17 : vector<3x128xf32>
    %19 = math.sin %18 : vector<3x128xf32>
    %20 = math.cos %18 : vector<3x128xf32>
    %cst_4 = arith.constant 2.000000e+00 : f32
    %21 = vector.broadcast %cst_4 : f32 to vector<3x128xf32>
    %22 = arith.mulf %21, %19 : vector<3x128xf32>
    %23 = arith.mulf %22, %20 : vector<3x128xf32>
    %24 = arith.mulf %20, %20 : vector<3x128xf32>
    %25 = arith.mulf %19, %19 : vector<3x128xf32>
    %26 = arith.subf %24, %25 : vector<3x128xf32>
    %cst_5 = arith.constant 2.000000e+00 : f32
    %27 = vector.broadcast %cst_5 : f32 to vector<3x128xf32>
    %28 = arith.mulf %27, %23 : vector<3x128xf32>
    %29 = arith.mulf %28, %26 : vector<3x128xf32>
    %30 = arith.mulf %26, %26 : vector<3x128xf32>
    %31 = arith.mulf %23, %23 : vector<3x128xf32>
    %32 = arith.subf %30, %31 : vector<3x128xf32>
    %33 = vector.extract_strided_slice %3 {offsets = [0, 0], sizes = [1, 128], strides = [1, 1]} : vector<3x128xf32> to vector<1x128xf32>
    %34 = vector.shape_cast %33 : vector<1x128xf32> to vector<128xf32>
    %c0_6 = arith.constant 0 : index
    %c0_7 = arith.constant 0 : index
    %35 = vector.load %arg2[%c0_6, %c0_7] : memref<39x128xf32, #tpu.memory_space<vmem>>, vector<1x128xf32>
    %36 = vector.shape_cast %35 : vector<1x128xf32> to vector<128xf32>
    %37 = vector.shape_cast %34 : vector<128xf32> to vector<1x128xf32>
    tpu.vector_store %arg2[%c0_6, %c0_7], %37 {strides = array<i32>} : memref<39x128xf32, #tpu.memory_space<vmem>>, vector<1x128xf32>,
    %38 = vector.extract_strided_slice %4 {offsets = [0, 0], sizes = [1, 128], strides = [1, 1]} : vector<3x128xf32> to vector<1x128xf32>
    %39 = vector.shape_cast %38 : vector<1x128xf32> to vector<128xf32>
    %c18 = arith.constant 18 : index
    %c0_8 = arith.constant 0 : index
    %40 = vector.load %arg2[%c18, %c0_8] : memref<39x128xf32, #tpu.memory_space<vmem>>, vector<1x128xf32>
    %41 = vector.shape_cast %40 : vector<1x128xf32> to vector<128xf32>
    %42 = vector.shape_cast %39 : vector<128xf32> to vector<1x128xf32>
    tpu.vector_store %arg2[%c18, %c0_8], %42 {strides = array<i32>} : memref<39x128xf32, #tpu.memory_space<vmem>>, vector<1x128xf32>,
    %43 = vector.extract_strided_slice %7 {offsets = [0, 0], sizes = [1, 128], strides = [1, 1]} : vector<3x128xf32> to vector<1x128xf32>
    %44 = vector.shape_cast %43 : vector<1x128xf32> to vector<128xf32>
    %c1 = arith.constant 1 : index
    %c0_9 = arith.constant 0 : index
    %45 = vector.load %arg2[%c1, %c0_9] : memref<39x128xf32, #tpu.memory_space<vmem>>, vector<1x128xf32>
    %46 = vector.shape_cast %45 : vector<1x128xf32> to vector<128xf32>
    %47 = vector.shape_cast %44 : vector<128xf32> to vector<1x128xf32>
    tpu.vector_store %arg2[%c1, %c0_9], %47 {strides = array<i32>} : memref<39x128xf32, #tpu.memory_space<vmem>>, vector<1x128xf32>,
    %48 = vector.extract_strided_slice %10 {offsets = [0, 0], sizes = [1, 128], strides = [1, 1]} : vector<3x128xf32> to vector<1x128xf32>
    %49 = vector.shape_cast %48 : vector<1x128xf32> to vector<128xf32>
    %c19 = arith.constant 19 : index
    %c0_10 = arith.constant 0 : index
    %50 = vector.load %arg2[%c19, %c0_10] : memref<39x128xf32, #tpu.memory_space<vmem>>, vector<1x128xf32>
    %51 = vector.shape_cast %50 : vector<1x128xf32> to vector<128xf32>
    %52 = vector.shape_cast %49 : vector<128xf32> to vector<1x128xf32>
    tpu.vector_store %arg2[%c19, %c0_10], %52 {strides = array<i32>} : memref<39x128xf32, #tpu.memory_space<vmem>>, vector<1x128xf32>,
    %53 = vector.extract_strided_slice %13 {offsets = [0, 0], sizes = [1, 128], strides = [1, 1]} : vector<3x128xf32> to vector<1x128xf32>
    %54 = vector.shape_cast %53 : vector<1x128xf32> to vector<128xf32>
    %c2 = arith.constant 2 : index
    %c0_11 = arith.constant 0 : index
    %55 = vector.load %arg2[%c2, %c0_11] : memref<39x128xf32, #tpu.memory_space<vmem>>, vector<1x128xf32>
    %56 = vector.shape_cast %55 : vector<1x128xf32> to vector<128xf32>
    %57 = vector.shape_cast %54 : vector<128xf32> to vector<1x128xf32>
    tpu.vector_store %arg2[%c2, %c0_11], %57 {strides = array<i32>} : memref<39x128xf32, #tpu.memory_space<vmem>>, vector<1x128xf32>,
    %58 = vector.extract_strided_slice %16 {offsets = [0, 0], sizes = [1, 128], strides = [1, 1]} : vector<3x128xf32> to vector<1x128xf32>
    %59 = vector.shape_cast %58 : vector<1x128xf32> to vector<128xf32>
    %c20 = arith.constant 20 : index
    %c0_12 = arith.constant 0 : index
    %60 = vector.load %arg2[%c20, %c0_12] : memref<39x128xf32, #tpu.memory_space<vmem>>, vector<1x128xf32>
    %61 = vector.shape_cast %60 : vector<1x128xf32> to vector<128xf32>
    %62 = vector.shape_cast %59 : vector<128xf32> to vector<1x128xf32>
    tpu.vector_store %arg2[%c20, %c0_12], %62 {strides = array<i32>} : memref<39x128xf32, #tpu.memory_space<vmem>>, vector<1x128xf32>,
    %63 = vector.extract_strided_slice %19 {offsets = [0, 0], sizes = [1, 128], strides = [1, 1]} : vector<3x128xf32> to vector<1x128xf32>
    %64 = vector.shape_cast %63 : vector<1x128xf32> to vector<128xf32>
    %c3 = arith.constant 3 : index
    %c0_13 = arith.constant 0 : index
    %65 = vector.load %arg2[%c3, %c0_13] : memref<39x128xf32, #tpu.memory_space<vmem>>, vector<1x128xf32>
    %66 = vector.shape_cast %65 : vector<1x128xf32> to vector<128xf32>
    %67 = vector.shape_cast %64 : vector<128xf32> to vector<1x128xf32>
    tpu.vector_store %arg2[%c3, %c0_13], %67 {strides = array<i32>} : memref<39x128xf32, #tpu.memory_space<vmem>>, vector<1x128xf32>,
    %68 = vector.extract_strided_slice %20 {offsets = [0, 0], sizes = [1, 128], strides = [1, 1]} : vector<3x128xf32> to vector<1x128xf32>
    %69 = vector.shape_cast %68 : vector<1x128xf32> to vector<128xf32>
    %c21 = arith.constant 21 : index
    %c0_14 = arith.constant 0 : index
    %70 = vector.load %arg2[%c21, %c0_14] : memref<39x128xf32, #tpu.memory_space<vmem>>, vector<1x128xf32>
    %71 = vector.shape_cast %70 : vector<1x128xf32> to vector<128xf32>
    %72 = vector.shape_cast %69 : vector<128xf32> to vector<1x128xf32>
    tpu.vector_store %arg2[%c21, %c0_14], %72 {strides = array<i32>} : memref<39x128xf32, #tpu.memory_space<vmem>>, vector<1x128xf32>,
    %73 = vector.extract_strided_slice %23 {offsets = [0, 0], sizes = [1, 128], strides = [1, 1]} : vector<3x128xf32> to vector<1x128xf32>
    %74 = vector.shape_cast %73 : vector<1x128xf32> to vector<128xf32>
    %c4 = arith.constant 4 : index
    %c0_15 = arith.constant 0 : index
    %75 = vector.load %arg2[%c4, %c0_15] : memref<39x128xf32, #tpu.memory_space<vmem>>, vector<1x128xf32>
    %76 = vector.shape_cast %75 : vector<1x128xf32> to vector<128xf32>
    %77 = vector.shape_cast %74 : vector<128xf32> to vector<1x128xf32>
    tpu.vector_store %arg2[%c4, %c0_15], %77 {strides = array<i32>} : memref<39x128xf32, #tpu.memory_space<vmem>>, vector<1x128xf32>,
    %78 = vector.extract_strided_slice %26 {offsets = [0, 0], sizes = [1, 128], strides = [1, 1]} : vector<3x128xf32> to vector<1x128xf32>
    %79 = vector.shape_cast %78 : vector<1x128xf32> to vector<128xf32>
    %c22 = arith.constant 22 : index
    %c0_16 = arith.constant 0 : index
    %80 = vector.load %arg2[%c22, %c0_16] : memref<39x128xf32, #tpu.memory_space<vmem>>, vector<1x128xf32>
    %81 = vector.shape_cast %80 : vector<1x128xf32> to vector<128xf32>
    %82 = vector.shape_cast %79 : vector<128xf32> to vector<1x128xf32>
    tpu.vector_store %arg2[%c22, %c0_16], %82 {strides = array<i32>} : memref<39x128xf32, #tpu.memory_space<vmem>>, vector<1x128xf32>,
    %83 = vector.extract_strided_slice %29 {offsets = [0, 0], sizes = [1, 128], strides = [1, 1]} : vector<3x128xf32> to vector<1x128xf32>
    %84 = vector.shape_cast %83 : vector<1x128xf32> to vector<128xf32>
    %c5 = arith.constant 5 : index
    %c0_17 = arith.constant 0 : index
    %85 = vector.load %arg2[%c5, %c0_17] : memref<39x128xf32, #tpu.memory_space<vmem>>, vector<1x128xf32>
    %86 = vector.shape_cast %85 : vector<1x128xf32> to vector<128xf32>
    %87 = vector.shape_cast %84 : vector<128xf32> to vector<1x128xf32>
    tpu.vector_store %arg2[%c5, %c0_17], %87 {strides = array<i32>} : memref<39x128xf32, #tpu.memory_space<vmem>>, vector<1x128xf32>,
    %88 = vector.extract_strided_slice %32 {offsets = [0, 0], sizes = [1, 128], strides = [1, 1]} : vector<3x128xf32> to vector<1x128xf32>
    %89 = vector.shape_cast %88 : vector<1x128xf32> to vector<128xf32>
    %c23 = arith.constant 23 : index
    %c0_18 = arith.constant 0 : index
    %90 = vector.load %arg2[%c23, %c0_18] : memref<39x128xf32, #tpu.memory_space<vmem>>, vector<1x128xf32>
    %91 = vector.shape_cast %90 : vector<1x128xf32> to vector<128xf32>
    %92 = vector.shape_cast %89 : vector<128xf32> to vector<1x128xf32>
    tpu.vector_store %arg2[%c23, %c0_18], %92 {strides = array<i32>} : memref<39x128xf32, #tpu.memory_space<vmem>>, vector<1x128xf32>,
    %93 = vector.extract_strided_slice %3 {offsets = [1, 0], sizes = [1, 128], strides = [1, 1]} : vector<3x128xf32> to vector<1x128xf32>
    %94 = vector.shape_cast %93 : vector<1x128xf32> to vector<128xf32>
    %c6 = arith.constant 6 : index
    %c0_19 = arith.constant 0 : index
    %95 = vector.load %arg2[%c6, %c0_19] : memref<39x128xf32, #tpu.memory_space<vmem>>, vector<1x128xf32>
    %96 = vector.shape_cast %95 : vector<1x128xf32> to vector<128xf32>
    %97 = vector.shape_cast %94 : vector<128xf32> to vector<1x128xf32>
    tpu.vector_store %arg2[%c6, %c0_19], %97 {strides = array<i32>} : memref<39x128xf32, #tpu.memory_space<vmem>>, vector<1x128xf32>,
    %98 = vector.extract_strided_slice %4 {offsets = [1, 0], sizes = [1, 128], strides = [1, 1]} : vector<3x128xf32> to vector<1x128xf32>
    %99 = vector.shape_cast %98 : vector<1x128xf32> to vector<128xf32>
    %c24 = arith.constant 24 : index
    %c0_20 = arith.constant 0 : index
    %100 = vector.load %arg2[%c24, %c0_20] : memref<39x128xf32, #tpu.memory_space<vmem>>, vector<1x128xf32>
    %101 = vector.shape_cast %100 : vector<1x128xf32> to vector<128xf32>
    %102 = vector.shape_cast %99 : vector<128xf32> to vector<1x128xf32>
    tpu.vector_store %arg2[%c24, %c0_20], %102 {strides = array<i32>} : memref<39x128xf32, #tpu.memory_space<vmem>>, vector<1x128xf32>,
    %103 = vector.extract_strided_slice %7 {offsets = [1, 0], sizes = [1, 128], strides = [1, 1]} : vector<3x128xf32> to vector<1x128xf32>
    %104 = vector.shape_cast %103 : vector<1x128xf32> to vector<128xf32>
    %c7 = arith.constant 7 : index
    %c0_21 = arith.constant 0 : index
    %105 = vector.load %arg2[%c7, %c0_21] : memref<39x128xf32, #tpu.memory_space<vmem>>, vector<1x128xf32>
    %106 = vector.shape_cast %105 : vector<1x128xf32> to vector<128xf32>
    %107 = vector.shape_cast %104 : vector<128xf32> to vector<1x128xf32>
    tpu.vector_store %arg2[%c7, %c0_21], %107 {strides = array<i32>} : memref<39x128xf32, #tpu.memory_space<vmem>>, vector<1x128xf32>,
    %108 = vector.extract_strided_slice %10 {offsets = [1, 0], sizes = [1, 128], strides = [1, 1]} : vector<3x128xf32> to vector<1x128xf32>
    %109 = vector.shape_cast %108 : vector<1x128xf32> to vector<128xf32>
    %c25 = arith.constant 25 : index
    %c0_22 = arith.constant 0 : index
    %110 = vector.load %arg2[%c25, %c0_22] : memref<39x128xf32, #tpu.memory_space<vmem>>, vector<1x128xf32>
    %111 = vector.shape_cast %110 : vector<1x128xf32> to vector<128xf32>
    %112 = vector.shape_cast %109 : vector<128xf32> to vector<1x128xf32>
    tpu.vector_store %arg2[%c25, %c0_22], %112 {strides = array<i32>} : memref<39x128xf32, #tpu.memory_space<vmem>>, vector<1x128xf32>,
    %113 = vector.extract_strided_slice %13 {offsets = [1, 0], sizes = [1, 128], strides = [1, 1]} : vector<3x128xf32> to vector<1x128xf32>
    %114 = vector.shape_cast %113 : vector<1x128xf32> to vector<128xf32>
    %c8 = arith.constant 8 : index
    %c0_23 = arith.constant 0 : index
    %115 = vector.load %arg2[%c8, %c0_23] : memref<39x128xf32, #tpu.memory_space<vmem>>, vector<1x128xf32>
    %116 = vector.shape_cast %115 : vector<1x128xf32> to vector<128xf32>
    %117 = vector.shape_cast %114 : vector<128xf32> to vector<1x128xf32>
    tpu.vector_store %arg2[%c8, %c0_23], %117 {strides = array<i32>} : memref<39x128xf32, #tpu.memory_space<vmem>>, vector<1x128xf32>,
    %118 = vector.extract_strided_slice %16 {offsets = [1, 0], sizes = [1, 128], strides = [1, 1]} : vector<3x128xf32> to vector<1x128xf32>
    %119 = vector.shape_cast %118 : vector<1x128xf32> to vector<128xf32>
    %c26 = arith.constant 26 : index
    %c0_24 = arith.constant 0 : index
    %120 = vector.load %arg2[%c26, %c0_24] : memref<39x128xf32, #tpu.memory_space<vmem>>, vector<1x128xf32>
    %121 = vector.shape_cast %120 : vector<1x128xf32> to vector<128xf32>
    %122 = vector.shape_cast %119 : vector<128xf32> to vector<1x128xf32>
    tpu.vector_store %arg2[%c26, %c0_24], %122 {strides = array<i32>} : memref<39x128xf32, #tpu.memory_space<vmem>>, vector<1x128xf32>,
    %123 = vector.extract_strided_slice %19 {offsets = [1, 0], sizes = [1, 128], strides = [1, 1]} : vector<3x128xf32> to vector<1x128xf32>
    %124 = vector.shape_cast %123 : vector<1x128xf32> to vector<128xf32>
    %c9 = arith.constant 9 : index
    %c0_25 = arith.constant 0 : index
    %125 = vector.load %arg2[%c9, %c0_25] : memref<39x128xf32, #tpu.memory_space<vmem>>, vector<1x128xf32>
    %126 = vector.shape_cast %125 : vector<1x128xf32> to vector<128xf32>
    %127 = vector.shape_cast %124 : vector<128xf32> to vector<1x128xf32>
    tpu.vector_store %arg2[%c9, %c0_25], %127 {strides = array<i32>} : memref<39x128xf32, #tpu.memory_space<vmem>>, vector<1x128xf32>,
    %128 = vector.extract_strided_slice %20 {offsets = [1, 0], sizes = [1, 128], strides = [1, 1]} : vector<3x128xf32> to vector<1x128xf32>
    %129 = vector.shape_cast %128 : vector<1x128xf32> to vector<128xf32>
    %c27 = arith.constant 27 : index
    %c0_26 = arith.constant 0 : index
    %130 = vector.load %arg2[%c27, %c0_26] : memref<39x128xf32, #tpu.memory_space<vmem>>, vector<1x128xf32>
    %131 = vector.shape_cast %130 : vector<1x128xf32> to vector<128xf32>
    %132 = vector.shape_cast %129 : vector<128xf32> to vector<1x128xf32>
    tpu.vector_store %arg2[%c27, %c0_26], %132 {strides = array<i32>} : memref<39x128xf32, #tpu.memory_space<vmem>>, vector<1x128xf32>,
    %133 = vector.extract_strided_slice %23 {offsets = [1, 0], sizes = [1, 128], strides = [1, 1]} : vector<3x128xf32> to vector<1x128xf32>
    %134 = vector.shape_cast %133 : vector<1x128xf32> to vector<128xf32>
    %c10 = arith.constant 10 : index
    %c0_27 = arith.constant 0 : index
    %135 = vector.load %arg2[%c10, %c0_27] : memref<39x128xf32, #tpu.memory_space<vmem>>, vector<1x128xf32>
    %136 = vector.shape_cast %135 : vector<1x128xf32> to vector<128xf32>
    %137 = vector.shape_cast %134 : vector<128xf32> to vector<1x128xf32>
    tpu.vector_store %arg2[%c10, %c0_27], %137 {strides = array<i32>} : memref<39x128xf32, #tpu.memory_space<vmem>>, vector<1x128xf32>,
    %138 = vector.extract_strided_slice %26 {offsets = [1, 0], sizes = [1, 128], strides = [1, 1]} : vector<3x128xf32> to vector<1x128xf32>
    %139 = vector.shape_cast %138 : vector<1x128xf32> to vector<128xf32>
    %c28 = arith.constant 28 : index
    %c0_28 = arith.constant 0 : index
    %140 = vector.load %arg2[%c28, %c0_28] : memref<39x128xf32, #tpu.memory_space<vmem>>, vector<1x128xf32>
    %141 = vector.shape_cast %140 : vector<1x128xf32> to vector<128xf32>
    %142 = vector.shape_cast %139 : vector<128xf32> to vector<1x128xf32>
    tpu.vector_store %arg2[%c28, %c0_28], %142 {strides = array<i32>} : memref<39x128xf32, #tpu.memory_space<vmem>>, vector<1x128xf32>,
    %143 = vector.extract_strided_slice %29 {offsets = [1, 0], sizes = [1, 128], strides = [1, 1]} : vector<3x128xf32> to vector<1x128xf32>
    %144 = vector.shape_cast %143 : vector<1x128xf32> to vector<128xf32>
    %c11 = arith.constant 11 : index
    %c0_29 = arith.constant 0 : index
    %145 = vector.load %arg2[%c11, %c0_29] : memref<39x128xf32, #tpu.memory_space<vmem>>, vector<1x128xf32>
    %146 = vector.shape_cast %145 : vector<1x128xf32> to vector<128xf32>
    %147 = vector.shape_cast %144 : vector<128xf32> to vector<1x128xf32>
    tpu.vector_store %arg2[%c11, %c0_29], %147 {strides = array<i32>} : memref<39x128xf32, #tpu.memory_space<vmem>>, vector<1x128xf32>,
    %148 = vector.extract_strided_slice %32 {offsets = [1, 0], sizes = [1, 128], strides = [1, 1]} : vector<3x128xf32> to vector<1x128xf32>
    %149 = vector.shape_cast %148 : vector<1x128xf32> to vector<128xf32>
    %c29 = arith.constant 29 : index
    %c0_30 = arith.constant 0 : index
    %150 = vector.load %arg2[%c29, %c0_30] : memref<39x128xf32, #tpu.memory_space<vmem>>, vector<1x128xf32>
    %151 = vector.shape_cast %150 : vector<1x128xf32> to vector<128xf32>
    %152 = vector.shape_cast %149 : vector<128xf32> to vector<1x128xf32>
    tpu.vector_store %arg2[%c29, %c0_30], %152 {strides = array<i32>} : memref<39x128xf32, #tpu.memory_space<vmem>>, vector<1x128xf32>,
    %153 = vector.extract_strided_slice %3 {offsets = [2, 0], sizes = [1, 128], strides = [1, 1]} : vector<3x128xf32> to vector<1x128xf32>
    %154 = vector.shape_cast %153 : vector<1x128xf32> to vector<128xf32>
    %c12 = arith.constant 12 : index
    %c0_31 = arith.constant 0 : index
    %155 = vector.load %arg2[%c12, %c0_31] : memref<39x128xf32, #tpu.memory_space<vmem>>, vector<1x128xf32>
    %156 = vector.shape_cast %155 : vector<1x128xf32> to vector<128xf32>
    %157 = vector.shape_cast %154 : vector<128xf32> to vector<1x128xf32>
    tpu.vector_store %arg2[%c12, %c0_31], %157 {strides = array<i32>} : memref<39x128xf32, #tpu.memory_space<vmem>>, vector<1x128xf32>,
    %158 = vector.extract_strided_slice %4 {offsets = [2, 0], sizes = [1, 128], strides = [1, 1]} : vector<3x128xf32> to vector<1x128xf32>
    %159 = vector.shape_cast %158 : vector<1x128xf32> to vector<128xf32>
    %c30 = arith.constant 30 : index
    %c0_32 = arith.constant 0 : index
    %160 = vector.load %arg2[%c30, %c0_32] : memref<39x128xf32, #tpu.memory_space<vmem>>, vector<1x128xf32>
    %161 = vector.shape_cast %160 : vector<1x128xf32> to vector<128xf32>
    %162 = vector.shape_cast %159 : vector<128xf32> to vector<1x128xf32>
    tpu.vector_store %arg2[%c30, %c0_32], %162 {strides = array<i32>} : memref<39x128xf32, #tpu.memory_space<vmem>>, vector<1x128xf32>,
    %163 = vector.extract_strided_slice %7 {offsets = [2, 0], sizes = [1, 128], strides = [1, 1]} : vector<3x128xf32> to vector<1x128xf32>
    %164 = vector.shape_cast %163 : vector<1x128xf32> to vector<128xf32>
    %c13 = arith.constant 13 : index
    %c0_33 = arith.constant 0 : index
    %165 = vector.load %arg2[%c13, %c0_33] : memref<39x128xf32, #tpu.memory_space<vmem>>, vector<1x128xf32>
    %166 = vector.shape_cast %165 : vector<1x128xf32> to vector<128xf32>
    %167 = vector.shape_cast %164 : vector<128xf32> to vector<1x128xf32>
    tpu.vector_store %arg2[%c13, %c0_33], %167 {strides = array<i32>} : memref<39x128xf32, #tpu.memory_space<vmem>>, vector<1x128xf32>,
    %168 = vector.extract_strided_slice %10 {offsets = [2, 0], sizes = [1, 128], strides = [1, 1]} : vector<3x128xf32> to vector<1x128xf32>
    %169 = vector.shape_cast %168 : vector<1x128xf32> to vector<128xf32>
    %c31 = arith.constant 31 : index
    %c0_34 = arith.constant 0 : index
    %170 = vector.load %arg2[%c31, %c0_34] : memref<39x128xf32, #tpu.memory_space<vmem>>, vector<1x128xf32>
    %171 = vector.shape_cast %170 : vector<1x128xf32> to vector<128xf32>
    %172 = vector.shape_cast %169 : vector<128xf32> to vector<1x128xf32>
    tpu.vector_store %arg2[%c31, %c0_34], %172 {strides = array<i32>} : memref<39x128xf32, #tpu.memory_space<vmem>>, vector<1x128xf32>,
    %173 = vector.extract_strided_slice %13 {offsets = [2, 0], sizes = [1, 128], strides = [1, 1]} : vector<3x128xf32> to vector<1x128xf32>
    %174 = vector.shape_cast %173 : vector<1x128xf32> to vector<128xf32>
    %c14 = arith.constant 14 : index
    %c0_35 = arith.constant 0 : index
    %175 = vector.load %arg2[%c14, %c0_35] : memref<39x128xf32, #tpu.memory_space<vmem>>, vector<1x128xf32>
    %176 = vector.shape_cast %175 : vector<1x128xf32> to vector<128xf32>
    %177 = vector.shape_cast %174 : vector<128xf32> to vector<1x128xf32>
    tpu.vector_store %arg2[%c14, %c0_35], %177 {strides = array<i32>} : memref<39x128xf32, #tpu.memory_space<vmem>>, vector<1x128xf32>,
    %178 = vector.extract_strided_slice %16 {offsets = [2, 0], sizes = [1, 128], strides = [1, 1]} : vector<3x128xf32> to vector<1x128xf32>
    %179 = vector.shape_cast %178 : vector<1x128xf32> to vector<128xf32>
    %c32 = arith.constant 32 : index
    %c0_36 = arith.constant 0 : index
    %180 = vector.load %arg2[%c32, %c0_36] : memref<39x128xf32, #tpu.memory_space<vmem>>, vector<1x128xf32>
    %181 = vector.shape_cast %180 : vector<1x128xf32> to vector<128xf32>
    %182 = vector.shape_cast %179 : vector<128xf32> to vector<1x128xf32>
    tpu.vector_store %arg2[%c32, %c0_36], %182 {strides = array<i32>} : memref<39x128xf32, #tpu.memory_space<vmem>>, vector<1x128xf32>,
    %183 = vector.extract_strided_slice %19 {offsets = [2, 0], sizes = [1, 128], strides = [1, 1]} : vector<3x128xf32> to vector<1x128xf32>
    %184 = vector.shape_cast %183 : vector<1x128xf32> to vector<128xf32>
    %c15 = arith.constant 15 : index
    %c0_37 = arith.constant 0 : index
    %185 = vector.load %arg2[%c15, %c0_37] : memref<39x128xf32, #tpu.memory_space<vmem>>, vector<1x128xf32>
    %186 = vector.shape_cast %185 : vector<1x128xf32> to vector<128xf32>
    %187 = vector.shape_cast %184 : vector<128xf32> to vector<1x128xf32>
    tpu.vector_store %arg2[%c15, %c0_37], %187 {strides = array<i32>} : memref<39x128xf32, #tpu.memory_space<vmem>>, vector<1x128xf32>,
    %188 = vector.extract_strided_slice %20 {offsets = [2, 0], sizes = [1, 128], strides = [1, 1]} : vector<3x128xf32> to vector<1x128xf32>
    %189 = vector.shape_cast %188 : vector<1x128xf32> to vector<128xf32>
    %c33 = arith.constant 33 : index
    %c0_38 = arith.constant 0 : index
    %190 = vector.load %arg2[%c33, %c0_38] : memref<39x128xf32, #tpu.memory_space<vmem>>, vector<1x128xf32>
    %191 = vector.shape_cast %190 : vector<1x128xf32> to vector<128xf32>
    %192 = vector.shape_cast %189 : vector<128xf32> to vector<1x128xf32>
    tpu.vector_store %arg2[%c33, %c0_38], %192 {strides = array<i32>} : memref<39x128xf32, #tpu.memory_space<vmem>>, vector<1x128xf32>,
    %193 = vector.extract_strided_slice %23 {offsets = [2, 0], sizes = [1, 128], strides = [1, 1]} : vector<3x128xf32> to vector<1x128xf32>
    %194 = vector.shape_cast %193 : vector<1x128xf32> to vector<128xf32>
    %c16 = arith.constant 16 : index
    %c0_39 = arith.constant 0 : index
    %195 = vector.load %arg2[%c16, %c0_39] : memref<39x128xf32, #tpu.memory_space<vmem>>, vector<1x128xf32>
    %196 = vector.shape_cast %195 : vector<1x128xf32> to vector<128xf32>
    %197 = vector.shape_cast %194 : vector<128xf32> to vector<1x128xf32>
    tpu.vector_store %arg2[%c16, %c0_39], %197 {strides = array<i32>} : memref<39x128xf32, #tpu.memory_space<vmem>>, vector<1x128xf32>,
    %198 = vector.extract_strided_slice %26 {offsets = [2, 0], sizes = [1, 128], strides = [1, 1]} : vector<3x128xf32> to vector<1x128xf32>
    %199 = vector.shape_cast %198 : vector<1x128xf32> to vector<128xf32>
    %c34 = arith.constant 34 : index
    %c0_40 = arith.constant 0 : index
    %200 = vector.load %arg2[%c34, %c0_40] : memref<39x128xf32, #tpu.memory_space<vmem>>, vector<1x128xf32>
    %201 = vector.shape_cast %200 : vector<1x128xf32> to vector<128xf32>
    %202 = vector.shape_cast %199 : vector<128xf32> to vector<1x128xf32>
    tpu.vector_store %arg2[%c34, %c0_40], %202 {strides = array<i32>} : memref<39x128xf32, #tpu.memory_space<vmem>>, vector<1x128xf32>,
    %203 = vector.extract_strided_slice %29 {offsets = [2, 0], sizes = [1, 128], strides = [1, 1]} : vector<3x128xf32> to vector<1x128xf32>
    %204 = vector.shape_cast %203 : vector<1x128xf32> to vector<128xf32>
    %c17 = arith.constant 17 : index
    %c0_41 = arith.constant 0 : index
    %205 = vector.load %arg2[%c17, %c0_41] : memref<39x128xf32, #tpu.memory_space<vmem>>, vector<1x128xf32>
    %206 = vector.shape_cast %205 : vector<1x128xf32> to vector<128xf32>
    %207 = vector.shape_cast %204 : vector<128xf32> to vector<1x128xf32>
    tpu.vector_store %arg2[%c17, %c0_41], %207 {strides = array<i32>} : memref<39x128xf32, #tpu.memory_space<vmem>>, vector<1x128xf32>,
    %208 = vector.extract_strided_slice %32 {offsets = [2, 0], sizes = [1, 128], strides = [1, 1]} : vector<3x128xf32> to vector<1x128xf32>
    %209 = vector.shape_cast %208 : vector<1x128xf32> to vector<128xf32>
    %c35 = arith.constant 35 : index
    %c0_42 = arith.constant 0 : index
    %210 = vector.load %arg2[%c35, %c0_42] : memref<39x128xf32, #tpu.memory_space<vmem>>, vector<1x128xf32>
    %211 = vector.shape_cast %210 : vector<1x128xf32> to vector<128xf32>
    %212 = vector.shape_cast %209 : vector<128xf32> to vector<1x128xf32>
    tpu.vector_store %arg2[%c35, %c0_42], %212 {strides = array<i32>} : memref<39x128xf32, #tpu.memory_space<vmem>>, vector<1x128xf32>,
    %c36 = arith.constant 36 : index
    %c0_43 = arith.constant 0 : index
    %213 = vector.load %arg2[%c36, %c0_43] : memref<39x128xf32, #tpu.memory_space<vmem>>, vector<3x128xf32>
    tpu.vector_store %arg2[%c36, %c0_43], %0 {strides = array<i32>} : memref<39x128xf32, #tpu.memory_space<vmem>>, vector<3x128xf32>,
    return
  }
  func.func @transform_0(%arg0: i32) -> (i32, i32) {
    %c0_i32 = arith.constant 0 : i32
    %c0_i32_0 = arith.constant 0 : i32
    return %c0_i32, %arg0 : i32, i32
  }
  func.func @transform_1(%arg0: i32) -> (i32, i32) {
    %c0_i32 = arith.constant 0 : i32
    %c0_i32_0 = arith.constant 0 : i32
    return %c0_i32, %arg0 : i32, i32
  }
}

</mosaic_0001>

<bundles_post_ra>
// kernel: tpu_custom_call.1
= control target key start
LH: loop header
LB: loop body
LE: loop exit
PB: predicated region body
PF: predicated region fallthrough
CT: control target
= control target key end

     0   :  { %6 = vsyncpa [#allocation3], 0  ;;  %s912_s0 = inlined_call_operand.hbm [shape: f32[3,128], index: 0, kind: input, shape index: {}]   ;;  %s913_s1 = inlined_call_operand.hbm [shape: f32[39,128], index: 1, kind: output, shape index: {}]  }
   0x1   :  { %7 = vsyncpa [#allocation4], 0  ;;  %s687_s6 = smov [#allocation2]   ;;  %s639_s10 = scalar_lea.hbm %s912_s0, 64 }
   0x2   :  { %s14_s7 = sshll.u32 %s687_s6, 4  ;;  %p640_p0 = scmp.ne.s32.totalorder %s912_s0, %s639_s10  ;;  %s15_s7 = int_to_ptr.vmem [resolvable:$true] %s14_s7 }
   0x3   :  { %p643_p1 = scmp.lt.u32.totalorder %s639_s10, %s912_s0 }
   0x5   :  { %p645_p2 = pnand %p643_p1, %p640_p0 }
   0x7   :  { %648 = shalt.err (!%p645_p2)
}
   0x8   :  { %s649_s15 = scalar_lea.vmem %s15_s7, 64  ;;  %p654_p4 = scmp.lt.s32.totalorder %s15_s7, %s15_s7 }
   0x9   :  { %p650_p3 = scmp.ne.s32.totalorder %s15_s7, %s649_s15  ;;  %p655_p5 = scmp.lt.s32.totalorder %s649_s15, %s649_s15 }
   0xb   :  { %p656_p6 = por %p655_p5, %p654_p4 }
   0xd   :  { %p657_p7 = pnand %p656_p6, %p650_p3 }
   0xf   :  { %660 = shalt.err (!%p657_p7)
}
  0x10   :  { %17 = dma.hbm_to_vmem [thread:$0]  %s912_s0, 64, %s15_s7, [#allocation3]  }
  0x11   :  { %683 = dma.done.wait [#allocation3], 64  }
  0x12   :  { %684 = vsyncadd [#allocation3], 4294967232  ;;  %v719_v0 = vld [vmem:[#allocation2] sm:$0x7]  ;;  %v688_v21 = vmov 683565275  }
  0x13   :  { %v22_v1 = vand.u32 2147483647, %v719_v0  ;;  %v25_v2 = vand.u32 2139095040, %v719_v0  ;;  %v724_v3 = vmul.f32 8.0, %v719_v0  ;;  %v689_v23 = vmov 2475754826  }
  0x14   :  { %v690_v25 = vmov 2131351028   ;;  %v691_v27 = vmov 2102212464   ;;  %v692_v29 = vmov 920167782  }
  0x15   :  { %v26_v4 = vshrl.u32 %v25_v2, 23  ;;  %v29_v5 = vand.u32 8388607, %v22_v1  ;;  %v240_v6 = vand.u32 2147483647, %v724_v3  ;;  %v243_v7 = vand.u32 2139095040, %v724_v3 }
  0x16   :  { %v693_v36 = vmov 1326507024   ;;  %vm24_vm14 = vcmp.lt.s32.totalorder %v719_v0, 0  ;;  %vm23_vm15 = vcmp.le.f32.partialorder %v22_v1, 0.7853982  ;;  %s694_s0 = smov [#allocation5]  }
  0x17   :  { %v597_v8 = vadd.s32 4294967169, %v26_v4  ;;  %v244_v9 = vshrl.u32 %v243_v7, 23  ;;  %v30_v11 = vor.u32 8388608, %v29_v5  ;;  %v732_v13 = vand.u32 8388607, %v240_v6  ;;  %s585_s18 = sshll.u32 %s694_s0, 4  ;;  %s586_s18 = int_to_ptr.vmem [resolvable:$true] %s585_s18 }
  0x18   :  { %s661_s19 = scalar_lea.vmem %s586_s18, 640  ;;  %p666_p9 = scmp.lt.s32.totalorder %s586_s18, %s586_s18 }
  0x19   :  { %v32_v10 = vadd.s32 1, %v597_v8  ;;  %v605_v12 = vadd.s32 4294967169, %v244_v9  ;;  %v734_v18 = vshll.u32 %v30_v11, 8  ;;  %v248_v19 = vor.u32 8388608, %v732_v13  ;;  %p662_p8 = scmp.ne.s32.totalorder %s586_s18, %s661_s19  ;;  %p667_p10 = scmp.lt.s32.totalorder %s661_s19, %s661_s19 }
  0x1b   :  { %vm33_vm0 = vcmp.gt.s32.totalorder %v32_v10, 0  ;;  %v250_v15 = vadd.s32 1, %v605_v12  ;;  %p668_p11 = por %p667_p10, %p666_p9 }
  0x1c   :  { %v34_v14 = vsel %vm33_vm0, %v32_v10, 0  ;;  %vm242_vm0 = vcmp.lt.s32.totalorder %v724_v3, 0 }
  0x1d   :  { %v35_v16 = vshrl.u32 %v34_v14, 5  ;;  %v36_v17 = vand.u32 31, %v34_v14  ;;  %vm251_vm1 = vcmp.gt.s32.totalorder %v250_v15, 0  ;;  %p669_p12 = pnand %p668_p11, %p662_p8 }
  0x1e   :  { %v252_v41 = vsel %vm251_vm1, %v250_v15, 0  ;;  %vm241_vm1 = vcmp.le.f32.partialorder %v240_v6, 0.7853982 }
  0x1f   :  { %v37_v20 = vsub.s32 32, %v36_v17  ;;  %v39_v22 = vshll.u32 %v688_v21, %v36_v17  ;;  %v42_v24 = vshll.u32 %v689_v23, %v36_v17  ;;  %v45_v26 = vshll.u32 %v690_v25, %v36_v17 }
  0x20   :  { %v48_v28 = vshll.u32 %v691_v27, %v36_v17  ;;  %v51_v30 = vshll.u32 %v692_v29, %v36_v17  ;;  %vm54_vm2 = vcmp.lt.s32.totalorder %v35_v16, 1  ;;  %vm55_vm3 = vcmp.lt.s32.totalorder %v35_v16, 2 }
  0x21   :  { %v38_v31 = vshrl.u32 %v688_v21, %v37_v20  ;;  %v40_v32 = vshrl.u32 %v689_v23, %v37_v20  ;;  %v43_v33 = vshrl.u32 %v690_v25, %v37_v20  ;;  %v46_v34 = vshrl.u32 %v691_v27, %v37_v20 }
  0x22   :  { %v49_v35 = vshrl.u32 %v692_v29, %v37_v20  ;;  %v52_v37 = vshrl.u32 %v693_v36, %v37_v20  ;;  %vm56_vm4 = vcmp.lt.s32.totalorder %v35_v16, 3  ;;  %vm57_vm5 = vcmp.lt.s32.totalorder %v35_v16, 4 }
  0x23   :  { %v41_v38 = vor.u32 %v40_v32, %v39_v22  ;;  %v44_v39 = vor.u32 %v43_v33, %v42_v24  ;;  %v47_v40 = vor.u32 %v46_v34, %v45_v26  ;;  %v253_v44 = vshrl.u32 %v252_v41, 5 }
  0x24   :  { %v50_v42 = vor.u32 %v49_v35, %v48_v28  ;;  %v53_v43 = vor.u32 %v52_v37, %v51_v30  ;;  %v254_v45 = vand.u32 31, %v252_v41 }
  0x25   :  { %v58_v46 = vsel %vm54_vm2, %v38_v31, %v41_v38  ;;  %v59_v47 = vsel %vm57_vm5, %v47_v40, 2102212464  ;;  %v62_v48 = vsel %vm54_vm2, %v41_v38, %v44_v39  ;;  %v66_v49 = vsel %vm54_vm2, %v44_v39, %v47_v40 }
  0x26   :  { %v60_v50 = vsel %vm56_vm4, %v44_v39, %v59_v47  ;;  %v63_v51 = vsel %vm57_vm5, %v50_v42, 920167782  ;;  %v67_v52 = vsel %vm57_vm5, %v53_v43, 1326507024  ;;  %v255_v53 = vsub.s32 32, %v254_v45 }
  0x27   :  { %v61_v54 = vsel %vm55_vm3, %v58_v46, %v60_v50  ;;  %v64_v55 = vsel %vm56_vm4, %v47_v40, %v63_v51  ;;  %v68_v56 = vsel %vm56_vm4, %v50_v42, %v67_v52  ;;  %v257_v57 = vshll.u32 %v688_v21, %v254_v45 }
  0x28   :  { %v65_v58 = vsel %vm55_vm3, %v62_v48, %v64_v55  ;;  %v69_v59 = vsel %vm55_vm3, %v66_v49, %v68_v56  ;;  %v77_v60 = vmul.u32 %v734_v18, %v61_v54  ;;  %v256_v61 = vshrl.u32 %v688_v21, %v255_v53 }
  0x29   :  { %v749_v62 = vmul.u32.u64.low %v734_v18, %v69_v59  ;;  %v750_v63 = vmul.u32.u64.high %v734_v18, %v69_v59, %v749_v62  ;;  %v753_v2 = vmul.u32.u64.low %v734_v18, %v65_v58  ;;  %v754_v4 = vmul.u32.u64.high %v734_v18, %v65_v58, %v753_v2 }
  0x2a   :  { %v258_v5 = vshrl.u32 %v689_v23, %v255_v53  ;;  %v260_v7 = vshll.u32 %v689_v23, %v254_v45  ;;  %v261_v8 = vshrl.u32 %v690_v25, %v255_v53  ;;  %v263_v9 = vshll.u32 %v690_v25, %v254_v45 }
  0x2b   :  { %v264_v10 = vshrl.u32 %v691_v27, %v255_v53  ;;  %v266_v11 = vshll.u32 %v691_v27, %v254_v45  ;;  %v267_v12 = vshrl.u32 %v692_v29, %v255_v53  ;;  %v269_v14 = vshll.u32 %v692_v29, %v254_v45 }
  0x2c   :  { %v259_v15 = vor.u32 %v258_v5, %v257_v57  ;;  %v262_v16 = vor.u32 %v261_v8, %v260_v7  ;;  %v270_v17 = vshrl.u32 %v693_v36, %v255_v53  ;;  %vm272_vm6 = vcmp.lt.s32.totalorder %v253_v44, 1 }
  0x2d   :  { %vm79_vm7 = vc.u32 %v750_v63, %v753_v2  ;;  %v80_v20 = vadd.s32 1, %v754_v4  ;;  %v265_v21 = vor.u32 %v264_v10, %v263_v9  ;;  %v288_v18 = vshll.u32 %v248_v19, 8 }
  0x2e   :  { %v268_v22 = vor.u32 %v267_v12, %v266_v11  ;;  %v271_v23 = vor.u32 %v270_v17, %v269_v14  ;;  %vm273_vm8 = vcmp.lt.s32.totalorder %v253_v44, 2  ;;  %vm274_vm9 = vcmp.lt.s32.totalorder %v253_v44, 3 }
  0x2f   :  { %v81_v24 = vsel %vm79_vm7, %v80_v20, %v754_v4  ;;  %vm275_vm10 = vcmp.lt.s32.totalorder %v253_v44, 4  ;;  %v276_v25 = vsel %vm272_vm6, %v256_v61, %v259_v15  ;;  %v280_v26 = vsel %vm272_vm6, %v259_v15, %v262_v16 }
  0x30   :  { %v82_v27 = vadd.s32 %v81_v24, %v77_v60  ;;  %v277_v28 = vsel %vm275_vm10, %v265_v21, 2102212464  ;;  %v281_v29 = vsel %vm275_vm10, %v268_v22, 920167782  ;;  %v284_v30 = vsel %vm272_vm6, %v262_v16, %v265_v21 }
  0x31   :  { %v278_v31 = vsel %vm274_vm9, %v262_v16, %v277_v28  ;;  %v282_v32 = vsel %vm274_vm9, %v265_v21, %v281_v29  ;;  %v285_v13 = vsel %vm275_vm10, %v271_v23, 1326507024  ;;  %v78_v55 = vadd.s32 %v753_v2, %v750_v63 }
  0x32   :  { %v83_v19 = vadd.s32 536870912, %v82_v27  ;;  %v283_v33 = vsel %vm273_vm8, %v280_v26, %v282_v32  ;;  %v286_v34 = vsel %vm274_vm9, %v268_v22, %v285_v13  ;;  %v279_v35 = vsel %vm273_vm8, %v276_v25, %v278_v31 }
  0x33   :  { %v287_v36 = vsel %vm273_vm8, %v284_v30, %v286_v34  ;;  %v767_v37 = vmul.u32.u64.low %v288_v18, %v283_v33  ;;  %v768_v38 = vmul.u32.u64.high %v288_v18, %v283_v33, %v767_v37  ;;  %v295_v43 = vmul.u32 %v288_v18, %v279_v35 }
  0x34   :  { %v84_v39 = vshrl.u32 %v83_v19, 30  ;;  %v770_v40 = vmul.u32.u64.low %v288_v18, %v287_v36  ;;  %v771_v41 = vmul.u32.u64.high %v288_v18, %v287_v36, %v770_v40  ;;  %vm114_vm8 = vweird.f32 %v719_v0 }
  0x35   :  { %v298_v45 = vadd.s32 1, %v768_v38  ;;  %vm332_vm9 = vweird.f32 %v724_v3  ;;  %vm491_vm10 = vcmask 1040384  }
  0x36   :  { %v85_v42 = vshll.u32 %v84_v39, 30  ;;  %vm297_vm11 = vc.u32 %v771_v41, %v767_v37  ;;  %v108_v15 = vsub.s32 4, %v84_v39  ;;  %v296_v63 = vadd.s32 %v767_v37, %v771_v41 }
  0x37   :  { %v299_v47 = vsel %vm297_vm11, %v298_v45, %v768_v38  ;;  %vm493_vm11 = vcmask 1041408  }
  0x38   :  { %v86_v46 = vsub.s32 %v82_v27, %v85_v42  ;;  %v300_v49 = vadd.s32 %v299_v47, %v295_v43  ;;  %v109_v22 = vsel %vm24_vm14, %v108_v15, %v84_v39 }
  0x39   :  { %v111_v27 = vsel %vm23_vm15, 0, %v109_v22 }
  0x3a   :  { %v88_v48 = vsub.s32 0, %v86_v46  ;;  %v301_v50 = vadd.s32 536870912, %v300_v49  ;;  %v115_v32 = vadd.s32 3, %v111_v27  ;;  %v219_v34 = vand.u32 3, %v111_v27 }
  0x3c   :  { %v598_v44 = vmin.u32 %v88_v48, %v86_v46  ;;  %v302_v52 = vshrl.u32 %v301_v50, 30  ;;  %v116_v33 = vand.u32 3, %v115_v32  ;;  %vm220_vm3 = vcmp.lt.s32.totalorder %v219_v34, 2 }
  0x3d   :  { %vm224_vm4 = vcmp.eq.s32.totalorder %v219_v34, 2  ;;  %vm221_vm6 = vcmp.eq.s32.totalorder %v219_v34, 0 }
  0x3e   :  { %v90_v51 = vclz %v598_v44  ;;  %v303_v54 = vshll.u32 %v302_v52, 30  ;;  %v326_v13 = vsub.s32 4, %v302_v52  ;;  %vm121_vm2 = vcmp.eq.s32.totalorder %v116_v33, 2 }
  0x3f   :  { %vm118_vm5 = vcmp.eq.s32.totalorder %v116_v33, 0  ;;  %vm117_vm7 = vcmp.lt.s32.totalorder %v116_v33, 2 }
  0x40   :  { %v599_v53 = vadd.s32 4294967294, %v90_v51  ;;  %v304_v57 = vsub.s32 %v300_v49, %v303_v54  ;;  %v327_v35 = vsel %vm242_vm0, %v326_v13, %v302_v52 }
  0x41   :  { %v329_v38 = vsel %vm241_vm1, 0, %v327_v35 }
  0x42   :  { %vm600_vm12 = vcmp.lt.s32.totalorder %v599_v53, 0  ;;  %v306_v61 = vsub.s32 0, %v304_v57  ;;  %v333_v45 = vadd.s32 3, %v329_v38  ;;  %v437_v50 = vand.u32 3, %v329_v38 }
  0x43   :  { %v93_v56 = vsel %vm600_vm12, 0, %v599_v53 }
  0x44   :  { %v94_v58 = vsub.s32 32, %v93_v56  ;;  %v95_v59 = vshll.u32 %v86_v46, %v93_v56  ;;  %v98_v60 = vsub.s32 4294967266, %v93_v56  ;;  %v606_v5 = vmin.u32 %v306_v61, %v304_v57 }
  0x45   :  { %v334_v53 = vand.u32 3, %v333_v45  ;;  %vm438_vm12 = vcmp.lt.s32.totalorder %v437_v50, 2 }
  0x46   :  { %v96_v62 = vshrl.u32 %v78_v55, %v94_v58  ;;  %v99_v4 = vadd.s32 127, %v98_v60  ;;  %v308_v9 = vclz %v606_v5 }
  0x48   :  { %v97_v7 = vor.u32 %v96_v62, %v95_v59  ;;  %v100_v8 = vshll.u32 %v99_v4, 23  ;;  %v607_v12 = vadd.s32 4294967294, %v308_v9 }
  0x4a   :  { %v101_v10 = vor.u32 4788187, %v100_v8  ;;  %v104_v11 = vcvt.s32.f32 %v97_v7  ;;  %vm608_vm13 = vcmp.lt.s32.totalorder %v607_v12, 0 }
  0x4b   :  { %v311_v16 = vsel %vm608_vm13, 0, %v607_v12  ;;  %vm439_vm13 = vcmp.eq.s32.totalorder %v437_v50, 0 }
  0x4c   :  { %v102_v14 = vand.u32 2147483647, %v101_v10  ;;  %v312_v17 = vsub.s32 32, %v311_v16  ;;  %v313_v20 = vshll.u32 %v304_v57, %v311_v16  ;;  %v316_v21 = vsub.s32 4294967266, %v311_v16 }
  0x4d   :  { %v569_v57 = vrot.slane %v719_v0, 4 }
  0x4e   :  { %v105_v2 = vmul.f32 %v104_v11, %v102_v14  ;;  %v314_v23 = vshrl.u32 %v296_v63, %v312_v17  ;;  %v317_v24 = vadd.s32 127, %v316_v21 }
  0x50   :  { %v106_v18 = vxor.u32 2147483648, %v105_v2  ;;  %v315_v28 = vor.u32 %v314_v23, %v313_v20  ;;  %v318_v29 = vshll.u32 %v317_v24, 23 }
  0x52   :  { %v107_v25 = vsel %vm24_vm14, %v106_v18, %v105_v2  ;;  %v319_v30 = vor.u32 4788187, %v318_v29  ;;  %v322_v31 = vcvt.s32.f32 %v315_v28  ;;  %vm335_vm14 = vcmp.lt.s32.totalorder %v334_v53, 2 }
  0x53   :  { %v110_v26 = vsel %vm23_vm15, %v719_v0, %v107_v25  ;;  %vm336_vm15 = vcmp.eq.s32.totalorder %v334_v53, 0 }
  0x54   :  { %631 = vcosq.f32 %v110_v26  ;;  %v320_v19 = vand.u32 2147483647, %v319_v30 }
  0x55   :  { %633 = vsinq.f32 %v110_v26 }
  0x56   :  { %v323_v1 = vmul.f32 %v322_v31, %v320_v19 }
  0x58   :  { %v324_v36 = vxor.u32 2147483648, %v323_v1 }
  0x5a   :  { %v325_v37 = vsel %vm242_vm0, %v324_v36, %v323_v1  ;;  %vm339_vm0 = vcmp.eq.s32.totalorder %v334_v53, 2 }
  0x5b   :  { %v328_v40 = vsel %vm241_vm1, %v724_v3, %v325_v37  ;;  %vm442_vm1 = vcmp.eq.s32.totalorder %v437_v50, 2 }
  0x5c   :  { %635 = vcosq.f32 %v328_v40 }
  0x5d   :  { %637 = vsinq.f32 %v328_v40 }
  0x5e   :  { %v632_v39 = vpop.eup %631 }
  0x5f   :  { %v634_v41 = vpop.eup %633  ;;  %v122_v42 = vxor.u32 2147483648, %v632_v39 }
  0x60   :  { %v119_v43 = vxor.u32 2147483648, %v634_v41 }
  0x61   :  { %v123_v6 = vsel %vm121_vm2, %v122_v42, %v634_v41  ;;  %v226_v46 = vsel %vm224_vm4, %v122_v42, %v634_v41  ;;  %vm495_vm2 = vcmask 1042432   ;;  %vm499_vm4 = vcmask 1044480  }
  0x62   :  { %v120_v47 = vsel %vm118_vm5, %v632_v39, %v119_v43  ;;  %v223_v48 = vsel %vm221_vm6, %v632_v39, %v119_v43  ;;  %vm501_vm5 = vcmask 1045504   ;;  %vm503_vm6 = vcmask 1046528  }
  0x63   :  { %v124_v49 = vsel %vm117_vm7, %v120_v47, %v123_v6  ;;  %v227_v44 = vsel %vm220_vm3, %v223_v48, %v226_v46  ;;  %vm497_vm3 = vcmask 1043456  }
  0x64   :  { %v788_v51 = vsel %vm114_vm8, nan, %v124_v49  ;;  %v790_v52 = vsel %vm114_vm8, nan, %v227_v44 }
  0x65   :  { %v229_v54 = vmul.f32 2.0, %v788_v51  ;;  %v231_v55 = vmul.f32 %v790_v52, %v790_v52  ;;  %v232_v56 = vmul.f32 %v788_v51, %v788_v51  ;;  %v473_v4 = vrot.slane %v788_v51, 3 }
  0x66   :  { %v636_v60 = vpop.eup %635  ;;  %v483_v5 = vrot.slane %v788_v51, 6  ;;  %v534_v11 = vrot.slane %v790_v52, 1  ;;  %v517_v15 = vrot.slane %v790_v52, 6  ;;  %v544_v63 = vrot.slane %v790_v52, 4 }
  0x67   :  { %v800_v58 = vmul.f32 %v229_v54, %v790_v52  ;;  %v802_v59 = vsub.f32 %v231_v55, %v232_v56  ;;  %v638_v7 = vpop.eup %637  ;;  %v340_v8 = vxor.u32 2147483648, %v636_v60 }
  0x68   :  { %v337_v14 = vxor.u32 2147483648, %v638_v7 }
  0x69   :  { %v234_v61 = vmul.f32 2.0, %v800_v58  ;;  %v458_v62 = vrot.slane %v800_v58, 7  ;;  %v236_v9 = vmul.f32 %v802_v59, %v802_v59  ;;  %v237_v10 = vmul.f32 %v800_v58, %v800_v58 }
  0x6a   :  { %v341_v2 = vsel %vm339_vm0, %v340_v8, %v638_v7  ;;  %v444_v16 = vsel %vm442_vm1, %v340_v8, %v638_v7  ;;  %v338_v21 = vsel %vm336_vm15, %v636_v60, %v337_v14  ;;  %v441_v18 = vsel %vm439_vm13, %v636_v60, %v337_v14 }
  0x6b   :  { %v814_v12 = vmul.f32 %v234_v61, %v802_v59  ;;  %v492_v17 = vsel %vm491_vm10, %v788_v51, %v458_v62  ;;  %v822_v20 = vsub.f32 %v236_v9, %v237_v10  ;;  %v475_v23 = vrot.slane %v800_v58, 2 }
  0x6c   :  { %v342_v24 = vsel %vm335_vm14, %v338_v21, %v341_v2  ;;  %v445_v25 = vsel %vm438_vm12, %v441_v18, %v444_v16  ;;  %v555_v27 = vsel %vm491_vm10, %v534_v11, %v802_v59  ;;  %v485_v3 = vrot.slane %v800_v58, 5 }
  0x6d   :  { %v461_v22 = vrot.slane %v814_v12, 6  ;;  %v477_v26 = vrot.slane %v814_v12, 1  ;;  %v835_v28 = vsel %vm332_vm9, nan, %v342_v24  ;;  %v839_v29 = vsel %vm332_vm9, nan, %v445_v25 }
  0x6e   :  { %v536_v31 = vrot.slane %v822_v20, 7  ;;  %v447_v32 = vmul.f32 2.0, %v835_v28  ;;  %v449_v13 = vmul.f32 %v839_v29, %v839_v29  ;;  %v450_v19 = vmul.f32 %v835_v28, %v835_v28 }
  0x6f   :  { %v494_v30 = vsel %vm493_vm11, %v492_v17, %v461_v22  ;;  %v464_v1 = vrot.slane %v835_v28, 5  ;;  %v520_v33 = vrot.slane %v802_v59, 5  ;;  %v538_v34 = vrot.slane %v839_v29, 6 }
  0x70   :  { %v546_v35 = vrot.slane %v802_v59, 3  ;;  %v448_v36 = vmul.f32 %v447_v32, %v839_v29  ;;  %v451_v37 = vsub.f32 %v449_v13, %v450_v19  ;;  %v487_v38 = vrot.slane %v814_v12, 4 }
  0x71   :  { %v556_v39 = vsel %vm493_vm11, %v555_v27, %v536_v31  ;;  %v496_v40 = vsel %vm495_vm2, %v494_v30, %v464_v1  ;;  %v505_v41 = vsel %vm491_vm10, %v477_v26, %v835_v28  ;;  %v562_v42 = vrot.slane %v822_v20, 2 }
  0x72   :  { %v564_v43 = vrot.slane %v839_v29, 1  ;;  %v452_v45 = vmul.f32 2.0, %v448_v36  ;;  %v467_v6 = vrot.slane %v448_v36, 4  ;;  %v479_v46 = vrot.slane %v448_v36, 7 }
  0x73   :  { %v454_v47 = vmul.f32 %v451_v37, %v451_v37  ;;  %v455_v48 = vmul.f32 %v448_v36, %v448_v36  ;;  %v523_v49 = vrot.slane %v822_v20, 4  ;;  %v540_v44 = vrot.slane %v451_v37, 5 }
  0x74   :  { %v557_v50 = vsel %vm495_vm2, %v556_v39, %v538_v34  ;;  %v453_v53 = vmul.f32 %v452_v45, %v451_v37  ;;  %v489_v54 = vrot.slane %v835_v28, 3  ;;  %v512_v55 = vrot.slane %v448_v36, 2 }
  0x75   :  { %v571_v56 = vsel %vm491_vm10, %v562_v42, %v564_v43  ;;  %v498_v58 = vsel %vm497_vm3, %v496_v40, %v467_v6  ;;  %v506_v59 = vsel %vm493_vm11, %v505_v41, %v479_v46  ;;  %v456_v60 = vsub.f32 %v454_v47, %v455_v48 }
  0x76   :  { %v526_v61 = vrot.slane %v839_v29, 3  ;;  %v470_v62 = vrot.slane %v453_v53, 3  ;;  %v481_v7 = vrot.slane %v453_v53, 6  ;;  %v514_v8 = vrot.slane %v453_v53, 1 }
  0x77   :  { %v558_v9 = vsel %vm497_vm3, %v557_v50, %v540_v44  ;;  %v529_v10 = vrot.slane %v451_v37, 2  ;;  %v542_v11 = vrot.slane %v456_v60, 4  ;;  %v566_v12 = vrot.slane %v456_v60, 7 }
  0x78   :  { %v572_v14 = vsel %vm493_vm11, %v571_v56, %v451_v37  ;;  %v500_v2 = vsel %vm499_vm4, %v498_v58, %v470_v62  ;;  %v507_v16 = vsel %vm495_vm2, %v506_v59, %v481_v7  ;;  %v532_v17 = vrot.slane %v456_v60, 1 }
  0x79   :  { %v548_v20 = vsel %vm491_vm10, %v512_v55, %v514_v8  ;;  %v502_v21 = vsel %vm501_vm5, %v500_v2, %v473_v4  ;;  %v508_v18 = vsel %vm497_vm3, %v507_v16, %v483_v5  ;;  %v559_v24 = vsel %vm499_vm4, %v558_v9, %v542_v11 }
  0x7a   :  { %v549_v22 = vsel %vm493_vm11, %v548_v20, %v517_v15  ;;  %v504_v25 = vsel %vm503_vm6, %v502_v21, %v475_v23  ;;  %v509_v26 = vsel %vm499_vm4, %v508_v18, %v485_v3  ;;  %v560_v4 = vsel %vm501_vm5, %v559_v24, %v544_v63 }
  0x7b   :  { %v550_v27 = vsel %vm495_vm2, %v549_v22, %v520_v33  ;;  %575 = vst [vmem:[#allocation5] sm:$0xff] %v504_v25  ;;  %v510_v51 = vsel %vm501_vm5, %v509_v26, %v487_v38  ;;  %v561_v15 = vsel %vm503_vm6, %v560_v4, %v546_v35  ;;  %v573_v28 = vsel %vm495_vm2, %v572_v14, %v566_v12 }
  0x7c   :  { %v551_v5 = vsel %vm497_vm3, %v550_v27, %v523_v49  ;;  %v511_v23 = vsel %vm503_vm6, %v510_v51, %v489_v54  ;;  %578 = vst [vmem:[#allocation5 + $0x18] sm:$0xff] %v561_v15  ;;  %v574_v52 = vsel %vm497_vm3, %v573_v28, %v569_v57 }
  0x7d   :  { %v552_v29 = vsel %vm499_vm4, %v551_v5, %v526_v61  ;;  %576 = vst [vmem:[#allocation5 + $0x8] sm:$0xff] %v511_v23  ;;  %579 = vst [vmem:[#allocation5 + $0x20] sm:$0x7f] %v574_v52 }
  0x7e   :  { %v553_v63 = vsel %vm501_vm5, %v552_v29, %v529_v10 }
  0x7f   :  { %v554_v30 = vsel %vm503_vm6, %v553_v63, %v532_v17 }
  0x80   :  { %577 = vst [vmem:[#allocation5 + $0x10] sm:$0xff] %v554_v30 }
  0x81   :  { %672 = shalt.err (!%p669_p12)
}
  0x82   :  { %s673_s22 = scalar_lea.hbm %s913_s1, 640 }
  0x83   :  { %p674_p13 = scmp.ne.s32.totalorder %s913_s1, %s673_s22  ;;  %p677_p0 = scmp.lt.u32.totalorder %s673_s22, %s913_s1 }
  0x85   :  { %p679_p1 = pnand %p677_p0, %p674_p13 }
  0x87   :  { %682 = shalt.err (!%p679_p1)
}
  0x88   :  { %s695_s27 = smov 128   ;;  %s696_s28 = smov 8  }
  0x89   :  { %591 = dma.vmem_to_hbm [thread:$0]  %s586_s18, 640, %s913_s1, [#allocation4], %s695_s27, %s695_s27, %s696_s28  }
  0x8a   :  { %685 = dma.done.wait [#allocation4], 640  }
  0x8b   :  { %686 = vsyncadd [#allocation4], 4294966656 }
  0x8c   :  { %595 = vsyncpa [#allocation3], 1 }
  0x8d   :  { %596 = vsyncpa [#allocation4], 1 }

// kernel: tpu_custom_call.1
= control target key start
LH: loop header
LB: loop body
LE: loop exit
PB: predicated region body
PF: predicated region fallthrough
CT: control target
= control target key end

     0   :  { %6 = vsyncpa [#allocation3], 0  ;;  %s718_s0 = inlined_call_operand.hbm [shape: f32[3,128], index: 0, kind: input, shape index: {}]   ;;  %s719_s1 = inlined_call_operand.hbm [shape: f32[39,128], index: 1, kind: output, shape index: {}]  }
   0x1   :  { %7 = vsyncpa [#allocation4], 0  ;;  %s601_s6 = smov [#allocation2]   ;;  %s553_s10 = scalar_lea.hbm %s718_s0, 64 }
   0x2   :  { %s14_s7 = sshll.u32 %s601_s6, 4  ;;  %p554_p0 = scmp.ne.s32.totalorder %s718_s0, %s553_s10  ;;  %s15_s7 = int_to_ptr.vmem [resolvable:$true] %s14_s7 }
   0x3   :  { %p557_p1 = scmp.lt.u32.totalorder %s553_s10, %s718_s0 }
   0x5   :  { %p559_p2 = pnand %p557_p1, %p554_p0 }
   0x7   :  { %562 = shalt.err (!%p559_p2)
}
   0x8   :  { %s563_s15 = scalar_lea.vmem %s15_s7, 64  ;;  %p568_p4 = scmp.lt.s32.totalorder %s15_s7, %s15_s7 }
   0x9   :  { %p564_p3 = scmp.ne.s32.totalorder %s15_s7, %s563_s15  ;;  %p569_p5 = scmp.lt.s32.totalorder %s563_s15, %s563_s15 }
   0xb   :  { %p570_p6 = por %p569_p5, %p568_p4 }
   0xd   :  { %p571_p7 = pnand %p570_p6, %p564_p3 }
   0xf   :  { %574 = shalt.err (!%p571_p7)
}
  0x10   :  { %17 = dma.hbm_to_vmem [thread:$0]  %s718_s0, 64, %s15_s7, [#allocation3]  }
  0x11   :  { %597 = dma.done.wait [#allocation3], 64  }
  0x12   :  { %598 = vsyncadd [#allocation3], 4294967232  ;;  %v633_v0 = vld [vmem:[#allocation2] sm:$0x7]  ;;  %v602_v21 = vmov 683565275  }
  0x13   :  { %v22_v1 = vand.u32 2147483647, %v633_v0  ;;  %v25_v2 = vand.u32 2139095040, %v633_v0  ;;  %493 = vst [vmem:[#allocation5 + $0x24] sm:$0x7] %v633_v0  ;;  %v639_v3 = vmul.f32 8.0, %v633_v0 }
  0x14   :  { %v603_v23 = vmov 2475754826   ;;  %v604_v25 = vmov 2131351028   ;;  %v605_v27 = vmov 2102212464  }
  0x15   :  { %v26_v4 = vshrl.u32 %v25_v2, 23  ;;  %v29_v5 = vand.u32 8388607, %v22_v1  ;;  %v240_v6 = vand.u32 2147483647, %v639_v3  ;;  %v243_v7 = vand.u32 2139095040, %v639_v3 }
  0x16   :  { %v606_v29 = vmov 920167782   ;;  %v607_v36 = vmov 1326507024   ;;  %vm24_vm14 = vcmp.lt.s32.totalorder %v633_v0, 0  ;;  %s608_s0 = smov [#allocation5]  }
  0x17   :  { %v511_v8 = vadd.s32 4294967169, %v26_v4  ;;  %v244_v9 = vshrl.u32 %v243_v7, 23  ;;  %v30_v11 = vor.u32 8388608, %v29_v5  ;;  %v647_v13 = vand.u32 8388607, %v240_v6  ;;  %s499_s18 = sshll.u32 %s608_s0, 4  ;;  %s500_s18 = int_to_ptr.vmem [resolvable:$true] %s499_s18 }
  0x18   :  { %vm23_vm15 = vcmp.le.f32.partialorder %v22_v1, 0.7853982  ;;  %s575_s19 = scalar_lea.vmem %s500_s18, 640  ;;  %p580_p9 = scmp.lt.s32.totalorder %s500_s18, %s500_s18 }
  0x19   :  { %v32_v10 = vadd.s32 1, %v511_v8  ;;  %v519_v12 = vadd.s32 4294967169, %v244_v9  ;;  %v649_v18 = vshll.u32 %v30_v11, 8  ;;  %v248_v19 = vor.u32 8388608, %v647_v13  ;;  %p576_p8 = scmp.ne.s32.totalorder %s500_s18, %s575_s19  ;;  %p581_p10 = scmp.lt.s32.totalorder %s575_s19, %s575_s19 }
  0x1b   :  { %vm33_vm0 = vcmp.gt.s32.totalorder %v32_v10, 0  ;;  %v250_v15 = vadd.s32 1, %v519_v12  ;;  %p582_p11 = por %p581_p10, %p580_p9 }
  0x1c   :  { %v34_v14 = vsel %vm33_vm0, %v32_v10, 0  ;;  %vm242_vm0 = vcmp.lt.s32.totalorder %v639_v3, 0 }
  0x1d   :  { %v35_v16 = vshrl.u32 %v34_v14, 5  ;;  %v36_v17 = vand.u32 31, %v34_v14  ;;  %vm251_vm1 = vcmp.gt.s32.totalorder %v250_v15, 0  ;;  %p583_p12 = pnand %p582_p11, %p576_p8 }
  0x1e   :  { %v252_v41 = vsel %vm251_vm1, %v250_v15, 0  ;;  %vm241_vm1 = vcmp.le.f32.partialorder %v240_v6, 0.7853982 }
  0x1f   :  { %v37_v20 = vsub.s32 32, %v36_v17  ;;  %v39_v22 = vshll.u32 %v602_v21, %v36_v17  ;;  %v42_v24 = vshll.u32 %v603_v23, %v36_v17  ;;  %v45_v26 = vshll.u32 %v604_v25, %v36_v17 }
  0x20   :  { %v48_v28 = vshll.u32 %v605_v27, %v36_v17  ;;  %v51_v30 = vshll.u32 %v606_v29, %v36_v17  ;;  %vm54_vm2 = vcmp.lt.s32.totalorder %v35_v16, 1  ;;  %vm55_vm3 = vcmp.lt.s32.totalorder %v35_v16, 2 }
  0x21   :  { %v38_v31 = vshrl.u32 %v602_v21, %v37_v20  ;;  %v40_v32 = vshrl.u32 %v603_v23, %v37_v20  ;;  %v43_v33 = vshrl.u32 %v604_v25, %v37_v20  ;;  %v46_v34 = vshrl.u32 %v605_v27, %v37_v20 }
  0x22   :  { %v49_v35 = vshrl.u32 %v606_v29, %v37_v20  ;;  %v52_v37 = vshrl.u32 %v607_v36, %v37_v20  ;;  %vm56_vm4 = vcmp.lt.s32.totalorder %v35_v16, 3  ;;  %vm57_vm5 = vcmp.lt.s32.totalorder %v35_v16, 4 }
  0x23   :  { %v41_v38 = vor.u32 %v40_v32, %v39_v22  ;;  %v44_v39 = vor.u32 %v43_v33, %v42_v24  ;;  %v47_v40 = vor.u32 %v46_v34, %v45_v26  ;;  %v253_v44 = vshrl.u32 %v252_v41, 5 }
  0x24   :  { %v50_v42 = vor.u32 %v49_v35, %v48_v28  ;;  %v53_v43 = vor.u32 %v52_v37, %v51_v30  ;;  %v254_v45 = vand.u32 31, %v252_v41 }
  0x25   :  { %v58_v46 = vsel %vm54_vm2, %v38_v31, %v41_v38  ;;  %v59_v47 = vsel %vm57_vm5, %v47_v40, 2102212464  ;;  %v62_v48 = vsel %vm54_vm2, %v41_v38, %v44_v39  ;;  %v66_v49 = vsel %vm54_vm2, %v44_v39, %v47_v40 }
  0x26   :  { %v60_v50 = vsel %vm56_vm4, %v44_v39, %v59_v47  ;;  %v63_v51 = vsel %vm57_vm5, %v50_v42, 920167782  ;;  %v67_v52 = vsel %vm57_vm5, %v53_v43, 1326507024  ;;  %v255_v53 = vsub.s32 32, %v254_v45 }
  0x27   :  { %v61_v54 = vsel %vm55_vm3, %v58_v46, %v60_v50  ;;  %v64_v55 = vsel %vm56_vm4, %v47_v40, %v63_v51  ;;  %v68_v56 = vsel %vm56_vm4, %v50_v42, %v67_v52  ;;  %v257_v57 = vshll.u32 %v602_v21, %v254_v45 }
  0x28   :  { %v65_v58 = vsel %vm55_vm3, %v62_v48, %v64_v55  ;;  %v69_v59 = vsel %vm55_vm3, %v66_v49, %v68_v56  ;;  %v77_v60 = vmul.u32 %v649_v18, %v61_v54  ;;  %v256_v61 = vshrl.u32 %v602_v21, %v255_v53 }
  0x29   :  { %v664_v62 = vmul.u32.u64.low %v649_v18, %v69_v59  ;;  %v665_v63 = vmul.u32.u64.high %v649_v18, %v69_v59, %v664_v62  ;;  %v668_v2 = vmul.u32.u64.low %v649_v18, %v65_v58  ;;  %v669_v4 = vmul.u32.u64.high %v649_v18, %v65_v58, %v668_v2 }
  0x2a   :  { %v258_v5 = vshrl.u32 %v603_v23, %v255_v53  ;;  %v260_v7 = vshll.u32 %v603_v23, %v254_v45  ;;  %v261_v8 = vshrl.u32 %v604_v25, %v255_v53  ;;  %v263_v9 = vshll.u32 %v604_v25, %v254_v45 }
  0x2b   :  { %v264_v10 = vshrl.u32 %v605_v27, %v255_v53  ;;  %v266_v11 = vshll.u32 %v605_v27, %v254_v45  ;;  %v267_v12 = vshrl.u32 %v606_v29, %v255_v53  ;;  %v269_v14 = vshll.u32 %v606_v29, %v254_v45 }
  0x2c   :  { %v259_v15 = vor.u32 %v258_v5, %v257_v57  ;;  %v262_v16 = vor.u32 %v261_v8, %v260_v7  ;;  %v270_v17 = vshrl.u32 %v607_v36, %v255_v53  ;;  %vm272_vm6 = vcmp.lt.s32.totalorder %v253_v44, 1 }
  0x2d   :  { %vm79_vm7 = vc.u32 %v665_v63, %v668_v2  ;;  %v80_v20 = vadd.s32 1, %v669_v4  ;;  %v265_v21 = vor.u32 %v264_v10, %v263_v9  ;;  %v288_v18 = vshll.u32 %v248_v19, 8 }
  0x2e   :  { %v268_v22 = vor.u32 %v267_v12, %v266_v11  ;;  %v271_v23 = vor.u32 %v270_v17, %v269_v14  ;;  %vm273_vm8 = vcmp.lt.s32.totalorder %v253_v44, 2  ;;  %vm274_vm9 = vcmp.lt.s32.totalorder %v253_v44, 3 }
  0x2f   :  { %v81_v24 = vsel %vm79_vm7, %v80_v20, %v669_v4  ;;  %vm275_vm10 = vcmp.lt.s32.totalorder %v253_v44, 4  ;;  %v276_v25 = vsel %vm272_vm6, %v256_v61, %v259_v15  ;;  %v280_v26 = vsel %vm272_vm6, %v259_v15, %v262_v16 }
  0x30   :  { %v82_v27 = vadd.s32 %v81_v24, %v77_v60  ;;  %v277_v28 = vsel %vm275_vm10, %v265_v21, 2102212464  ;;  %v281_v29 = vsel %vm275_vm10, %v268_v22, 920167782  ;;  %v284_v30 = vsel %vm272_vm6, %v262_v16, %v265_v21 }
  0x31   :  { %v278_v31 = vsel %vm274_vm9, %v262_v16, %v277_v28  ;;  %v282_v32 = vsel %vm274_vm9, %v265_v21, %v281_v29  ;;  %v285_v13 = vsel %vm275_vm10, %v271_v23, 1326507024  ;;  %v78_v55 = vadd.s32 %v668_v2, %v665_v63 }
  0x32   :  { %v83_v19 = vadd.s32 536870912, %v82_v27  ;;  %v283_v33 = vsel %vm273_vm8, %v280_v26, %v282_v32  ;;  %v286_v34 = vsel %vm274_vm9, %v268_v22, %v285_v13  ;;  %v279_v35 = vsel %vm273_vm8, %v276_v25, %v278_v31 }
  0x33   :  { %v287_v36 = vsel %vm273_vm8, %v284_v30, %v286_v34  ;;  %v682_v37 = vmul.u32.u64.low %v288_v18, %v283_v33  ;;  %v683_v38 = vmul.u32.u64.high %v288_v18, %v283_v33, %v682_v37  ;;  %v295_v43 = vmul.u32 %v288_v18, %v279_v35 }
  0x34   :  { %v84_v39 = vshrl.u32 %v83_v19, 30  ;;  %v685_v40 = vmul.u32.u64.low %v288_v18, %v287_v36  ;;  %v686_v41 = vmul.u32.u64.high %v288_v18, %v287_v36, %v685_v40  ;;  %vm114_vm8 = vweird.f32 %v633_v0 }
  0x35   :  { %v298_v45 = vadd.s32 1, %v683_v38 }
  0x36   :  { %v85_v42 = vshll.u32 %v84_v39, 30  ;;  %vm297_vm11 = vc.u32 %v686_v41, %v682_v37  ;;  %v108_v15 = vsub.s32 4, %v84_v39  ;;  %v296_v63 = vadd.s32 %v682_v37, %v686_v41 }
  0x37   :  { %v299_v47 = vsel %vm297_vm11, %v298_v45, %v683_v38 }
  0x38   :  { %v86_v46 = vsub.s32 %v82_v27, %v85_v42  ;;  %v300_v49 = vadd.s32 %v299_v47, %v295_v43  ;;  %v109_v22 = vsel %vm24_vm14, %v108_v15, %v84_v39 }
  0x39   :  { %v111_v27 = vsel %vm23_vm15, 0, %v109_v22 }
  0x3a   :  { %v88_v48 = vsub.s32 0, %v86_v46  ;;  %v301_v50 = vadd.s32 536870912, %v300_v49  ;;  %v115_v32 = vadd.s32 3, %v111_v27  ;;  %v219_v1 = vand.u32 3, %v111_v27 }
  0x3c   :  { %v512_v44 = vmin.u32 %v88_v48, %v86_v46  ;;  %v302_v52 = vshrl.u32 %v301_v50, 30  ;;  %v116_v34 = vand.u32 3, %v115_v32  ;;  %vm224_vm3 = vcmp.eq.s32.totalorder %v219_v1, 2 }
  0x3d   :  { %vm221_vm5 = vcmp.eq.s32.totalorder %v219_v1, 0  ;;  %vm220_vm7 = vcmp.lt.s32.totalorder %v219_v1, 2 }
  0x3e   :  { %v90_v51 = vclz %v512_v44  ;;  %v303_v54 = vshll.u32 %v302_v52, 30  ;;  %v326_v19 = vsub.s32 4, %v302_v52  ;;  %vm121_vm2 = vcmp.eq.s32.totalorder %v116_v34, 2 }
  0x3f   :  { %vm118_vm4 = vcmp.eq.s32.totalorder %v116_v34, 0  ;;  %vm117_vm6 = vcmp.lt.s32.totalorder %v116_v34, 2 }
  0x40   :  { %v513_v53 = vadd.s32 4294967294, %v90_v51  ;;  %v304_v57 = vsub.s32 %v300_v49, %v303_v54  ;;  %v327_v36 = vsel %vm242_vm0, %v326_v19, %v302_v52 }
  0x41   :  { %v329_v40 = vsel %vm241_vm1, 0, %v327_v36 }
  0x42   :  { %vm514_vm12 = vcmp.lt.s32.totalorder %v513_v53, 0  ;;  %v306_v61 = vsub.s32 0, %v304_v57  ;;  %v437_v52 = vand.u32 3, %v329_v40 }
  0x43   :  { %v93_v56 = vsel %vm514_vm12, 0, %v513_v53 }
  0x44   :  { %v94_v58 = vsub.s32 32, %v93_v56  ;;  %v95_v59 = vshll.u32 %v86_v46, %v93_v56  ;;  %v98_v60 = vsub.s32 4294967266, %v93_v56  ;;  %v520_v5 = vmin.u32 %v306_v61, %v304_v57 }
  0x45   :  { %v333_v46 = vadd.s32 3, %v329_v40  ;;  %vm442_vm9 = vcmp.eq.s32.totalorder %v437_v52, 2  ;;  %vm438_vm12 = vcmp.lt.s32.totalorder %v437_v52, 2 }
  0x46   :  { %v96_v62 = vshrl.u32 %v78_v55, %v94_v58  ;;  %v99_v4 = vadd.s32 127, %v98_v60  ;;  %v308_v9 = vclz %v520_v5 }
  0x48   :  { %v97_v7 = vor.u32 %v96_v62, %v95_v59  ;;  %v100_v8 = vshll.u32 %v99_v4, 23  ;;  %v521_v12 = vadd.s32 4294967294, %v308_v9 }
  0x4a   :  { %v101_v10 = vor.u32 4788187, %v100_v8  ;;  %v104_v11 = vcvt.s32.f32 %v97_v7  ;;  %vm522_vm13 = vcmp.lt.s32.totalorder %v521_v12, 0 }
  0x4b   :  { %v311_v16 = vsel %vm522_vm13, 0, %v521_v12  ;;  %vm439_vm13 = vcmp.eq.s32.totalorder %v437_v52, 0 }
  0x4c   :  { %v102_v14 = vand.u32 2147483647, %v101_v10  ;;  %v312_v17 = vsub.s32 32, %v311_v16  ;;  %v313_v20 = vshll.u32 %v304_v57, %v311_v16  ;;  %v316_v21 = vsub.s32 4294967266, %v311_v16 }
  0x4e   :  { %v105_v2 = vmul.f32 %v104_v11, %v102_v14  ;;  %v314_v23 = vshrl.u32 %v296_v63, %v312_v17  ;;  %v317_v24 = vadd.s32 127, %v316_v21 }
  0x50   :  { %v106_v18 = vxor.u32 2147483648, %v105_v2  ;;  %v315_v28 = vor.u32 %v314_v23, %v313_v20  ;;  %v318_v29 = vshll.u32 %v317_v24, 23 }
  0x52   :  { %v107_v25 = vsel %vm24_vm14, %v106_v18, %v105_v2  ;;  %v319_v30 = vor.u32 4788187, %v318_v29  ;;  %v322_v31 = vcvt.s32.f32 %v315_v28 }
  0x53   :  { %v110_v26 = vsel %vm23_vm15, %v633_v0, %v107_v25  ;;  %v334_v0 = vand.u32 3, %v333_v46  ;;  %vm332_vm15 = vweird.f32 %v639_v3 }
  0x54   :  { %545 = vcosq.f32 %v110_v26  ;;  %v320_v13 = vand.u32 2147483647, %v319_v30 }
  0x55   :  { %547 = vsinq.f32 %v110_v26  ;;  %vm339_vm10 = vcmp.eq.s32.totalorder %v334_v0, 2  ;;  %vm336_vm11 = vcmp.eq.s32.totalorder %v334_v0, 0  ;;  %vm335_vm14 = vcmp.lt.s32.totalorder %v334_v0, 2 }
  0x56   :  { %v323_v33 = vmul.f32 %v322_v31, %v320_v13 }
  0x58   :  { %v324_v35 = vxor.u32 2147483648, %v323_v33 }
  0x5a   :  { %v325_v37 = vsel %vm242_vm0, %v324_v35, %v323_v33 }
  0x5b   :  { %v328_v39 = vsel %vm241_vm1, %v639_v3, %v325_v37 }
  0x5c   :  { %549 = vcosq.f32 %v328_v39 }
  0x5d   :  { %551 = vsinq.f32 %v328_v39 }
  0x5e   :  { %v546_v38 = vpop.eup %545 }
  0x5f   :  { %v548_v41 = vpop.eup %547  ;;  %v122_v42 = vxor.u32 2147483648, %v546_v38 }
  0x60   :  { %v119_v43 = vxor.u32 2147483648, %v548_v41 }
  0x61   :  { %v123_v6 = vsel %vm121_vm2, %v122_v42, %v548_v41  ;;  %v226_v45 = vsel %vm224_vm3, %v122_v42, %v548_v41 }
  0x62   :  { %v120_v47 = vsel %vm118_vm4, %v546_v38, %v119_v43  ;;  %v223_v48 = vsel %vm221_vm5, %v546_v38, %v119_v43 }
  0x63   :  { %v124_v49 = vsel %vm117_vm6, %v120_v47, %v123_v6  ;;  %v227_v44 = vsel %vm220_vm7, %v223_v48, %v226_v45 }
  0x64   :  { %v125_v50 = vsel %vm114_vm8, nan, %v124_v49  ;;  %v228_v51 = vsel %vm114_vm8, nan, %v227_v44 }
  0x65   :  { %v229_v53 = vmul.f32 2.0, %v125_v50  ;;  %v232_v54 = vmul.f32 %v125_v50, %v125_v50  ;;  %457 = vst [vmem:[#allocation5] sm:$0x1] %v125_v50  ;;  %469 = vst [vmem:[#allocation5 + $0x5] sm:$0x2] %v125_v50  ;;  %v231_v55 = vmul.f32 %v228_v51, %v228_v51 }
  0x66   :  { %481 = vst [vmem:[#allocation5 + $0xa] sm:$0x4] %v125_v50  ;;  %458 = vst [vmem:[#allocation5 + $0x12] sm:$0x1] %v228_v51  ;;  %v550_v58 = vpop.eup %549 }
  0x67   :  { %470 = vst [vmem:[#allocation5 + $0x17] sm:$0x2] %v228_v51  ;;  %482 = vst [vmem:[#allocation5 + $0x1c] sm:$0x4] %v228_v51  ;;  %v230_v56 = vmul.f32 %v229_v53, %v228_v51  ;;  %v233_v57 = vsub.f32 %v231_v55, %v232_v54  ;;  %v552_v62 = vpop.eup %551  ;;  %v340_v4 = vxor.u32 2147483648, %v550_v58 }
  0x68   :  { %v337_v8 = vxor.u32 2147483648, %v552_v62 }
  0x69   :  { %459 = vst [vmem:[#allocation5 + $0x1] sm:$0x1] %v230_v56  ;;  %471 = vst [vmem:[#allocation5 + $0x6] sm:$0x2] %v230_v56  ;;  %v234_v59 = vmul.f32 2.0, %v230_v56  ;;  %v236_v60 = vmul.f32 %v233_v57, %v233_v57  ;;  %v237_v61 = vmul.f32 %v230_v56, %v230_v56  ;;  %v341_v9 = vsel %vm339_vm10, %v340_v4, %v552_v62 }
  0x6a   :  { %483 = vst [vmem:[#allocation5 + $0xb] sm:$0x4] %v230_v56  ;;  %460 = vst [vmem:[#allocation5 + $0x13] sm:$0x1] %v233_v57  ;;  %v444_v10 = vsel %vm442_vm9, %v340_v4, %v552_v62  ;;  %v338_v11 = vsel %vm336_vm11, %v550_v58, %v337_v8  ;;  %v441_v12 = vsel %vm439_vm13, %v550_v58, %v337_v8 }
  0x6b   :  { %472 = vst [vmem:[#allocation5 + $0x18] sm:$0x2] %v233_v57  ;;  %484 = vst [vmem:[#allocation5 + $0x1d] sm:$0x4] %v233_v57  ;;  %v235_v5 = vmul.f32 %v234_v59, %v233_v57  ;;  %v238_v7 = vsub.f32 %v236_v60, %v237_v61  ;;  %v342_v14 = vsel %vm335_vm14, %v338_v11, %v341_v9 }
  0x6c   :  { %v445_v15 = vsel %vm438_vm12, %v441_v12, %v444_v10  ;;  %v343_v63 = vsel %vm332_vm15, nan, %v342_v14 }
  0x6d   :  { %461 = vst [vmem:[#allocation5 + $0x2] sm:$0x1] %v235_v5  ;;  %473 = vst [vmem:[#allocation5 + $0x7] sm:$0x2] %v235_v5  ;;  %v446_v2 = vsel %vm332_vm15, nan, %v445_v15  ;;  %v447_v16 = vmul.f32 2.0, %v343_v63  ;;  %v450_v17 = vmul.f32 %v343_v63, %v343_v63 }
  0x6e   :  { %485 = vst [vmem:[#allocation5 + $0xc] sm:$0x4] %v235_v5  ;;  %462 = vst [vmem:[#allocation5 + $0x14] sm:$0x1] %v238_v7  ;;  %v449_v3 = vmul.f32 %v446_v2, %v446_v2 }
  0x6f   :  { %474 = vst [vmem:[#allocation5 + $0x19] sm:$0x2] %v238_v7  ;;  %486 = vst [vmem:[#allocation5 + $0x1e] sm:$0x4] %v238_v7  ;;  %v448_v20 = vmul.f32 %v447_v16, %v446_v2 }
  0x70   :  { %463 = vst [vmem:[#allocation5 + $0x3] sm:$0x1] %v343_v63  ;;  %475 = vst [vmem:[#allocation5 + $0x8] sm:$0x2] %v343_v63  ;;  %v451_v21 = vsub.f32 %v449_v3, %v450_v17 }
  0x71   :  { %487 = vst [vmem:[#allocation5 + $0xd] sm:$0x4] %v343_v63  ;;  %464 = vst [vmem:[#allocation5 + $0x15] sm:$0x1] %v446_v2  ;;  %v452_v18 = vmul.f32 2.0, %v448_v20  ;;  %v455_v23 = vmul.f32 %v448_v20, %v448_v20 }
  0x72   :  { %476 = vst [vmem:[#allocation5 + $0x1a] sm:$0x2] %v446_v2  ;;  %488 = vst [vmem:[#allocation5 + $0x1f] sm:$0x4] %v446_v2  ;;  %v454_v22 = vmul.f32 %v451_v21, %v451_v21 }
  0x73   :  { %465 = vst [vmem:[#allocation5 + $0x4] sm:$0x1] %v448_v20  ;;  %477 = vst [vmem:[#allocation5 + $0x9] sm:$0x2] %v448_v20  ;;  %v453_v24 = vmul.f32 %v452_v18, %v451_v21 }
  0x74   :  { %489 = vst [vmem:[#allocation5 + $0xe] sm:$0x4] %v448_v20  ;;  %466 = vst [vmem:[#allocation5 + $0x16] sm:$0x1] %v451_v21  ;;  %v456_v25 = vsub.f32 %v454_v22, %v455_v23 }
  0x75   :  { %478 = vst [vmem:[#allocation5 + $0x1b] sm:$0x2] %v451_v21  ;;  %490 = vst [vmem:[#allocation5 + $0x20] sm:$0x4] %v451_v21 }
  0x76   :  { %467 = vst [vmem:[#allocation5 + $0x5] sm:$0x1] %v453_v24  ;;  %479 = vst [vmem:[#allocation5 + $0xa] sm:$0x2] %v453_v24 }
  0x77   :  { %491 = vst [vmem:[#allocation5 + $0xf] sm:$0x4] %v453_v24  ;;  %468 = vst [vmem:[#allocation5 + $0x17] sm:$0x1] %v456_v25 }
  0x78   :  { %480 = vst [vmem:[#allocation5 + $0x1c] sm:$0x2] %v456_v25  ;;  %492 = vst [vmem:[#allocation5 + $0x21] sm:$0x4] %v456_v25 }
  0x79   :  { %586 = shalt.err (!%p583_p12)
}
  0x7a   :  { %s587_s22 = scalar_lea.hbm %s719_s1, 640 }
  0x7b   :  { %p588_p13 = scmp.ne.s32.totalorder %s719_s1, %s587_s22  ;;  %p591_p0 = scmp.lt.u32.totalorder %s587_s22, %s719_s1 }
  0x7d   :  { %p593_p1 = pnand %p591_p0, %p588_p13 }
  0x7f   :  { %596 = shalt.err (!%p593_p1)
}
  0x80   :  { %s609_s27 = smov 128   ;;  %s610_s28 = smov 8  }
  0x81   :  { %505 = dma.vmem_to_hbm [thread:$0]  %s500_s18, 640, %s719_s1, [#allocation4], %s609_s27, %s609_s27, %s610_s28  }
  0x82   :  { %599 = dma.done.wait [#allocation4], 640  }
  0x83   :  { %600 = vsyncadd [#allocation4], 4294966656 }
  0x84   :  { %509 = vsyncpa [#allocation3], 1 }
  0x85   :  { %510 = vsyncpa [#allocation4], 1 }

</bundles_post_ra>
